<compile_context>
chip_gen: v7x
topology: tpu7x:2x2x1
jax: 0.10.0
libtpu: 0.0.40
codegen_flags: <defaults>
</compile_context>

<pallas_src>
import jax
import jax.numpy as jnp
from jax import lax
from jax.experimental import pallas as pl
from jax.experimental.pallas import tpu as pltpu

# ---------------- hyper-parameters (model_size='1k') ----------------
D_MODEL = 4        # embedding_dim
NUM_HEADS = 2
HEAD_DIM = D_MODEL // NUM_HEADS
CONV_K = 4         # conv1d_kernel_size
FF_UP = 64         # ceil(1.3 * d_model / 64) * 64 (GatedFeedForward up dim)
H_D1 = 30          # hidden_dimension_dense1
H_D2 = 20          # hidden_dimension_dense2
NUM_FEATURES = 6   # num_of_features (input features)
EPS = 1e-5

# ---------------- packed parameter slab layout (single HBM->VMEM DMA) ----------
_SLAB_LANES = 128

_LAYOUT_SPEC = [
    ('w_in',   (NUM_FEATURES, D_MODEL)),
    ('w_conv', (CONV_K, D_MODEL)),
    ('w_gates', (2 * D_MODEL, 4 * D_MODEL)),   # [[w_if, 0], [0, w_zo]]
    ('r_all',  (D_MODEL, 4 * D_MODEL)),
    ('w_up_g', (D_MODEL, FF_UP)),
    ('w_up_v', (D_MODEL, FF_UP)),
    ('w_down', (FF_UP, D_MODEL)),
    ('w_d1',   (D_MODEL, H_D1)),
    ('w_d2',   (H_D1, H_D2)),
    ('w_out',  (H_D2, 1)),
    ('b_in',   (1, D_MODEL)),
    ('g_ln1',  (1, D_MODEL)),
    ('b_conv', (1, D_MODEL)),
    ('b_cell', (1, 4 * D_MODEL)),
    ('g_gn',   (1, D_MODEL)),
    ('g_ln2',  (1, D_MODEL)),
    ('g_post', (1, D_MODEL)),
    ('b_d1',   (1, H_D1)),
    ('b_d2',   (1, H_D2)),
    ('b_out',  (1, 1)),
]

_LAYOUT = {}
_off = 0
for _name, (_r, _c) in _LAYOUT_SPEC:
    _LAYOUT[_name] = (_off, _r, _c)
    _off += ((_r + 7) // 8) * 8          # 8-row alignment: no sublane-offset loads
_SLAB_ROWS = _off                        # = 256 rows -> 128 KiB slab


def _layernorm(x, gamma):
    mu = jnp.mean(x, axis=-1, keepdims=True)
    var = jnp.mean((x - mu) ** 2, axis=-1, keepdims=True)
    return (x - mu) * lax.rsqrt(var + EPS) * gamma


def _log_sigmoid(x):
    # stable log(sigmoid(x)) from primitives that lower cleanly in Mosaic
    return jnp.minimum(x, 0.0) - jnp.log(1.0 + jnp.exp(-jnp.abs(x)))


# ---------------- the single fused kernel ----------------
def _make_xlstm_kernel(B, S):
    """Fused forward: input proj -> sLSTM block -> post-norm -> MLP head.

    All activations are time-major 2-D: row index = s * B + b.
    """
    BS = B * S
    D, K, U, NH, DH = D_MODEL, CONV_K, FF_UP, NUM_HEADS, HEAD_DIM
    f32 = jnp.float32

    def kernel(x_ref, slab_ref, o_ref):
        def par(name):                                   # static slab slice
            off, r, c = _LAYOUT[name]
            return slab_ref[off:off + r, 0:c]

        # ---- input projection (all B*S tokens at once) ----
        x_in = (jnp.dot(x_ref[...], par('w_in'), preferred_element_type=f32)
                + par('b_in'))                                     # (BS, D)

        # ---- sLSTM block: pre-norm ----
        x_ln = _layernorm(x_in, par('g_ln1'))                      # (BS, D)

        # ---- causal depthwise conv (k=K) + swish: roll + mask per tap ----
        w_conv = par('w_conv')                                     # (K, D)
        row_idx = lax.broadcasted_iota(jnp.int32, (BS, D), 0)      # hoisted once
        conv = x_ln * w_conv[K - 1:K, :]                           # tap d=0
        for d in range(1, K):                                      # static unroll
            shifted = pltpu.roll(x_ln, shift=d * B, axis=0)        # time shift d
            shifted = jnp.where(row_idx >= d * B, shifted, 0.0)    # causal zeros
            conv = conv + shifted * w_conv[K - 1 - d:K - d, :]
        conv = conv + par('b_conv')
        x_c = conv * jax.nn.sigmoid(conv)                          # swish

        # ---- fused headwise gate pre-activations, gate-major [i|f|z|o] ----
        # [x_c | x_ln] @ [[w_if, 0], [0, w_zo]]  -> one MXU pass, no result concat
        lhs = jnp.concatenate([x_c, x_ln], axis=-1)                # (BS, 2D)
        wx = jnp.dot(lhs, par('w_gates'), preferred_element_type=f32)   # (BS, 4D)

        # ---- sLSTM recurrence: statically unrolled over S, batched over B ----
        r_all = par('r_all')                                       # (D, 4D)
        r_rows = [jnp.broadcast_to(r_all[j:j + 1, :], (B, 4 * D)) for j in range(D)]
        b_cell_b = jnp.broadcast_to(par('b_cell'), (B, 4 * D))     # hoisted

        zero = jnp.zeros((B, D), f32)
        y, c, n, m = zero, zero, zero, zero
        h_parts = []
        for t in range(S):                                         # static unroll
            rec = b_cell_b
            if t > 0:   # y == 0 at t == 0, skip the recurrent FMAs
                for j in range(D):
                    rec = rec + (jnp.broadcast_to(y[:, j:j + 1], (B, 4 * D))
                                 * r_rows[j])
            raw = wx[t * B:(t + 1) * B, :] + rec                   # (B, 4D)
            iraw = raw[:, 0 * D:1 * D]
            fraw = raw[:, 1 * D:2 * D]
            zraw = raw[:, 2 * D:3 * D]
            oraw = raw[:, 3 * D:4 * D]
            logfplusm = m + _log_sigmoid(fraw)
            m_new = jnp.maximum(iraw, logfplusm)
            i_g = jnp.exp(iraw - m_new)
            f_g = jnp.exp(logfplusm - m_new)
            o_g = jax.nn.sigmoid(oraw)
            c = f_g * c + i_g * jnp.tanh(zraw)
            n = f_g * n + i_g
            # approx EUP reciprocal + one Newton step: cheaper than an exact
            # divide on the serial chain, ~f32 accurate (keeps the ref check).
            inv_n = pl.reciprocal(n, approx=True)
            inv_n = inv_n * (2.0 - n * inv_n)
            y = o_g * c * inv_n
            m = m_new
            h_parts.append(y)
        # time-major rows: part t occupies rows t*B .. t*B+B-1 (contiguous)
        h = jnp.concatenate(h_parts, axis=0)                       # (BS, D)

        # ---- multi-head group norm (per-head, centered, weight-only) ----
        parts = []
        for hh in range(NH):                                       # NH=2, static
            seg = h[:, hh * DH:(hh + 1) * DH]
            mu = jnp.mean(seg, axis=-1, keepdims=True)
            var = jnp.mean((seg - mu) ** 2, axis=-1, keepdims=True)
            parts.append((seg - mu) * lax.rsqrt(var + EPS))
        h_n = jnp.concatenate(parts, axis=-1) * par('g_gn')
        x1 = x_in + h_n                                            # residual 1

        # ---- gated feed-forward sub-block (tanh-approx GELU) ----
        x_ln2 = _layernorm(x1, par('g_ln2'))
        up_g = jnp.dot(x_ln2, par('w_up_g'), preferred_element_type=f32)  # (BS, U)
        up_v = jnp.dot(x_ln2, par('w_up_v'), preferred_element_type=f32)  # (BS, U)
        ff = jnp.dot(jax.nn.gelu(up_g, approximate=True) * up_v,
                     par('w_down'), preferred_element_type=f32)
        x2 = x1 + ff                                               # residual 2

        # ---- post-blocks norm + dense head ----
        z = _layernorm(x2, par('g_post'))
        z = jnp.maximum(
            jnp.dot(z, par('w_d1'), preferred_element_type=f32) + par('b_d1'), 0.0)
        z = jnp.maximum(
            jnp.dot(z, par('w_d2'), preferred_element_type=f32) + par('b_d2'), 0.0)
        o_ref[...] = (jnp.dot(z, par('w_out'), preferred_element_type=f32)
                      + par('b_out'))

    return kernel


# ---------------- host-side parameter packing (one slab, one DMA) ----------------
def pack_params(p):
    D, U = D_MODEL, FF_UP
    derived = dict(p)
    # fused gate weight: [x_c | x_ln] @ [[w_if, 0], [0, w_zo]] = [i|f|z|o]
    w_gates = jnp.zeros((2 * D, 4 * D), jnp.float32)
    w_gates = w_gates.at[:D, :2 * D].set(p['w_if'])
    w_gates = w_gates.at[D:, 2 * D:].set(p['w_zo'])
    derived['w_gates'] = w_gates
    derived['w_up_g'] = p['w_up'][:, :U]
    derived['w_up_v'] = p['w_up'][:, U:]

    slab = jnp.zeros((_SLAB_ROWS, _SLAB_LANES), jnp.float32)
    for name, (off, r, c) in _LAYOUT.items():
        slab = slab.at[off:off + r, :c].set(derived[name].reshape(r, c))
    return slab


# ---------------- full forward (Pallas) ----------------
@jax.jit
def xlstm_forward(x, slab):
    B, S, F = x.shape
    # time-major rows (s*B + b): keeps the recurrence state 2-D and the per-step
    # gate slices contiguous on sublanes.
    x_tm = jnp.transpose(x, (1, 0, 2)).reshape(S * B, F)
    out = pl.pallas_call(
        _make_xlstm_kernel(B, S),
        out_shape=jax.ShapeDtypeStruct((S * B, 1), jnp.float32),
        # No grid: the whole problem (few KB of activations + one 128 KiB weight
        # slab) lives in VMEM for a single invocation; defaults = full-array
        # blocks -> exactly 2 input DMAs + 1 output DMA.
    )(x_tm, slab)
    return jnp.transpose(out.reshape(S, B, 1), (1, 0, 2))


# ---------------- parameter construction (deterministic, synthetic) ----------------
def init_params(key):
    ks = iter(jax.random.split(key, 32))

    def rnd(shape, scale=0.2):
        return scale * jax.random.normal(next(ks), shape, jnp.float32)

    def headwise_blockdiag(w_heads):
        nh, di, do = w_heads.shape
        m = jnp.zeros((nh * di, nh * do), jnp.float32)
        for h in range(nh):
            m = m.at[h * di:(h + 1) * di, h * do:(h + 1) * do].set(w_heads[h])
        return m

    # LinearHeadwiseExpand gate projections (bias=False): i, f from conv path; z, o raw
    w_i = headwise_blockdiag(rnd((NUM_HEADS, HEAD_DIM, HEAD_DIM), 0.5))
    w_f = headwise_blockdiag(rnd((NUM_HEADS, HEAD_DIM, HEAD_DIM), 0.5))
    w_z = headwise_blockdiag(rnd((NUM_HEADS, HEAD_DIM, HEAD_DIM), 0.5))
    w_o = headwise_blockdiag(rnd((NUM_HEADS, HEAD_DIM, HEAD_DIM), 0.5))
    # per-head recurrent kernel, one (DH,DH) block per gate -> (D, 4D) gate-major
    r_all = jnp.concatenate(
        [headwise_blockdiag(rnd((NUM_HEADS, HEAD_DIM, HEAD_DIM), 0.3))
         for _ in range(4)], axis=1)

    # cell bias, gate-major [i|f|z|o]; forget gate gets a power-law-style positive init
    f_bias = jnp.linspace(1.0, 4.0, D_MODEL, dtype=jnp.float32)
    zeros_d = jnp.zeros((D_MODEL,), jnp.float32)
    b_cell = jnp.concatenate([zeros_d, f_bias, zeros_d, zeros_d])[None, :]

    return {
        # input projection: Linear(NUM_FEATURES, D_MODEL)
        'w_in': rnd((NUM_FEATURES, D_MODEL), 0.3), 'b_in': rnd((1, D_MODEL), 0.1),
        # sLSTM block
        'g_ln1': 1.0 + rnd((1, D_MODEL), 0.05),
        'w_conv': rnd((CONV_K, D_MODEL), 0.3),      # depthwise causal conv (tap, channel)
        'b_conv': rnd((1, D_MODEL), 0.1),
        'w_if': jnp.concatenate([w_i, w_f], axis=1),    # (D, 2D)
        'w_zo': jnp.concatenate([w_z, w_o], axis=1),    # (D, 2D)
        'r_all': r_all,                                 # (D, 4D)
        'b_cell': b_cell,                               # (1, 4D)
        'g_gn': 1.0 + rnd((1, D_MODEL), 0.05),
        'g_ln2': 1.0 + rnd((1, D_MODEL), 0.05),
        'w_up': rnd((D_MODEL, 2 * FF_UP), 0.3),
        'w_down': rnd((FF_UP, D_MODEL), 0.3),
        # post-blocks norm + dense head
        'g_post': 1.0 + rnd((1, D_MODEL), 0.05),
        'w_d1': rnd((D_MODEL, H_D1), 0.3), 'b_d1': rnd((1, H_D1), 0.1),
        'w_d2': rnd((H_D1, H_D2), 0.3), 'b_d2': rnd((1, H_D2), 0.1),
        'w_out': rnd((H_D2, 1), 0.3), 'b_out': rnd((1, 1), 0.1),
    }


# ---------------- pure-JAX reference (same math) for a correctness check ----------------
_HI = jax.lax.Precision.HIGHEST


def _refdot(a, b):
    # HIGHEST keeps the XLA-side f32 dots as accurate as the in-kernel MXU f32
    # multi-pass matmuls (XLA's DEFAULT would silently drop to 1-pass bf16).
    return jnp.dot(a, b, precision=_HI)


def _slstm_block_ref(xb, p):   # xb: (S, D)
    S = xb.shape[0]
    x_ln = _layernorm(xb, p['g_ln1'])
    K = p['w_conv'].shape[0]
    xpad = jnp.concatenate([jnp.zeros((K - 1, D_MODEL), jnp.float32), x_ln], axis=0)
    conv = sum(xpad[k:k + S, :] * p['w_conv'][k:k + 1, :] for k in range(K)) + p['b_conv']
    x_c = conv * jax.nn.sigmoid(conv)
    wx = jnp.concatenate([_refdot(x_c, p['w_if']), _refdot(x_ln, p['w_zo'])], axis=-1)

    def step(carry, wx_t):
        y, c, n, m = carry
        raw = wx_t[None, :] + p['b_cell'] + _refdot(y, p['r_all'])
        D = D_MODEL
        iraw, fraw = raw[:, :D], raw[:, D:2 * D]
        zraw, oraw = raw[:, 2 * D:3 * D], raw[:, 3 * D:]
        logfplusm = m + _log_sigmoid(fraw)
        m_new = jnp.maximum(iraw, logfplusm)
        i_g, f_g = jnp.exp(iraw - m_new), jnp.exp(logfplusm - m_new)
        o_g = jax.nn.sigmoid(oraw)
        c_new = f_g * c + i_g * jnp.tanh(zraw)
        n_new = f_g * n + i_g
        y_new = o_g * (c_new / n_new)
        return (y_new, c_new, n_new, m_new), y_new[0]

    zeros = jnp.zeros((1, D_MODEL), jnp.float32)
    _, hs = lax.scan(step, (zeros, zeros, zeros, zeros), wx)

    h3 = hs.reshape(S, NUM_HEADS, HEAD_DIM)
    mu = jnp.mean(h3, axis=-1, keepdims=True)
    var = jnp.mean((h3 - mu) ** 2, axis=-1, keepdims=True)
    h_n = ((h3 - mu) * lax.rsqrt(var + EPS)).reshape(S, D_MODEL) * p['g_gn']
    x1 = xb + h_n
    up = _refdot(_layernorm(x1, p['g_ln2']), p['w_up'])
    ff = _refdot(jax.nn.gelu(up[:, :FF_UP], approximate=True) * up[:, FF_UP:],
                 p['w_down'])
    return x1 + ff


def xlstm_forward_ref(x, p):
    B, S, F = x.shape
    h = (_refdot(x.reshape(B * S, F), p['w_in']) + p['b_in']).reshape(B, S, D_MODEL)
    h = jax.vmap(lambda xb: _slstm_block_ref(xb, p))(h)
    z = _layernorm(h.reshape(B * S, D_MODEL), p['g_post'])
    z = jnp.maximum(_refdot(z, p['w_d1']) + p['b_d1'], 0.0)
    z = jnp.maximum(_refdot(z, p['w_d2']) + p['b_d2'], 0.0)
    return (_refdot(z, p['w_out']) + p['b_out']).reshape(B, S, 1)


if __name__ == "__main__":
    key = jax.random.PRNGKey(0)
    pkey, xkey = jax.random.split(key)
    params = init_params(pkey)
    slab = pack_params(params)                                  # one packed DMA
    x = jax.random.normal(xkey, (2, 8, NUM_FEATURES), jnp.float32)   # (B, S, features)

    out = jax.block_until_ready(xlstm_forward(x, slab))
    assert out.shape == (2, 8, 1), out.shape

    ref = xlstm_forward_ref(x, params)
    err = float(jnp.max(jnp.abs(out - ref)))
    assert jnp.allclose(out, ref, atol=2e-3, rtol=2e-3), ("mismatch vs reference", err)

    print("KERNEL_OK")
</pallas_src>

<mosaic_0001>
module attributes {stable_mosaic.version = 11 : i64} {
  func.func @kernel(%arg0: memref<16x6xf32, #tpu.memory_space<vmem>>, %arg1: memref<256x128xf32, #tpu.memory_space<vmem>>, %arg2: memref<16x1xf32, #tpu.memory_space<vmem>>) attributes {dimension_semantics = [], scalar_prefetch = 0 : i64, scratch_operands = 0 : i64, tpu.core_type = #tpu.core_type<tc>} {
    %c0 = arith.constant 0 : index
    %c0_0 = arith.constant 0 : index
    %0 = vector.load %arg0[%c0, %c0_0] : memref<16x6xf32, #tpu.memory_space<vmem>>, vector<16x6xf32>
    %c0_1 = arith.constant 0 : index
    %c0_2 = arith.constant 0 : index
    %1 = vector.load %arg1[%c0_1, %c0_2] : memref<256x128xf32, #tpu.memory_space<vmem>>, vector<6x4xf32>
    %cst = arith.constant dense<0.000000e+00> : vector<16x4xf32>
    %2 = tpu.matmul %0, %1, %cst {dimension_numbers = #tpu.dot_dimension_numbers<[1], [0], [0], [1], [0, 0, 1, 1], [], []>} : vector<16x6xf32>, vector<6x4xf32>, vector<16x4xf32> -> vector<16x4xf32>
    %c176 = arith.constant 176 : index
    %c0_3 = arith.constant 0 : index
    %3 = vector.load %arg1[%c176, %c0_3] : memref<256x128xf32, #tpu.memory_space<vmem>>, vector<1x4xf32>
    %4 = vector.broadcast %3 : vector<1x4xf32> to vector<16x4xf32>
    %5 = arith.addf %2, %4 : vector<16x4xf32>
    %c184 = arith.constant 184 : index
    %c0_4 = arith.constant 0 : index
    %6 = vector.load %arg1[%c184, %c0_4] : memref<256x128xf32, #tpu.memory_space<vmem>>, vector<1x4xf32>
    %cst_5 = arith.constant dense<0.000000e+00> : vector<16xf32>
    %7 = vector.multi_reduction <add>, %5, %cst_5 [1] : vector<16x4xf32> to vector<16xf32>
    %8 = vector.shape_cast %7 : vector<16xf32> to vector<16x1xf32>
    %cst_6 = arith.constant 4.000000e+00 : f32
    %9 = vector.broadcast %cst_6 : f32 to vector<16x1xf32>
    %10 = arith.divf %8, %9 : vector<16x1xf32>
    %11 = vector.broadcast %10 : vector<16x1xf32> to vector<16x4xf32>
    %12 = arith.subf %5, %11 : vector<16x4xf32>
    %13 = arith.mulf %12, %12 : vector<16x4xf32>
    %cst_7 = arith.constant dense<0.000000e+00> : vector<16xf32>
    %14 = vector.multi_reduction <add>, %13, %cst_7 [1] : vector<16x4xf32> to vector<16xf32>
    %15 = vector.shape_cast %14 : vector<16xf32> to vector<16x1xf32>
    %cst_8 = arith.constant 4.000000e+00 : f32
    %16 = vector.broadcast %cst_8 : f32 to vector<16x1xf32>
    %17 = arith.divf %15, %16 : vector<16x1xf32>
    %18 = vector.broadcast %10 : vector<16x1xf32> to vector<16x4xf32>
    %19 = arith.subf %5, %18 : vector<16x4xf32>
    %cst_9 = arith.constant 9.99999974E-6 : f32
    %20 = vector.broadcast %cst_9 : f32 to vector<16x1xf32>
    %21 = arith.addf %17, %20 : vector<16x1xf32>
    %22 = math.rsqrt %21 : vector<16x1xf32>
    %23 = vector.broadcast %22 : vector<16x1xf32> to vector<16x4xf32>
    %24 = arith.mulf %19, %23 : vector<16x4xf32>
    %25 = vector.broadcast %6 : vector<1x4xf32> to vector<16x4xf32>
    %26 = arith.mulf %24, %25 : vector<16x4xf32>
    %c8 = arith.constant 8 : index
    %c0_10 = arith.constant 0 : index
    %27 = vector.load %arg1[%c8, %c0_10] : memref<256x128xf32, #tpu.memory_space<vmem>>, vector<4x4xf32>
    %28 = tpu.iota {dimensions = array<i32: 0>} : vector<16x4xi32>
    %29 = vector.extract_strided_slice %27 {offsets = [3, 0], sizes = [1, 4], strides = [1, 1]} : vector<4x4xf32> to vector<1x4xf32>
    %30 = vector.broadcast %29 : vector<1x4xf32> to vector<16x4xf32>
    %31 = arith.mulf %26, %30 : vector<16x4xf32>
    %c2_i32 = arith.constant 2 : i32
    %32 = tpu.dynamic_rotate %26 by %c2_i32 dim 0 : vector<16x4xf32>, i32 -> vector<16x4xf32>
    %c2_i32_11 = arith.constant 2 : i32
    %33 = vector.broadcast %c2_i32_11 : i32 to vector<16x4xi32>
    %34 = arith.cmpi sge, %28, %33 : vector<16x4xi32>
    %cst_12 = arith.constant 0.000000e+00 : f32
    %35 = vector.broadcast %cst_12 : f32 to vector<16x4xf32>
    %36 = arith.select %34, %32, %35 : vector<16x4xi1>, vector<16x4xf32>
    %37 = vector.extract_strided_slice %27 {offsets = [2, 0], sizes = [1, 4], strides = [1, 1]} : vector<4x4xf32> to vector<1x4xf32>
    %38 = vector.broadcast %37 : vector<1x4xf32> to vector<16x4xf32>
    %39 = arith.mulf %36, %38 : vector<16x4xf32>
    %40 = arith.addf %31, %39 : vector<16x4xf32>
    %c4_i32 = arith.constant 4 : i32
    %41 = tpu.dynamic_rotate %26 by %c4_i32 dim 0 : vector<16x4xf32>, i32 -> vector<16x4xf32>
    %c4_i32_13 = arith.constant 4 : i32
    %42 = vector.broadcast %c4_i32_13 : i32 to vector<16x4xi32>
    %43 = arith.cmpi sge, %28, %42 : vector<16x4xi32>
    %cst_14 = arith.constant 0.000000e+00 : f32
    %44 = vector.broadcast %cst_14 : f32 to vector<16x4xf32>
    %45 = arith.select %43, %41, %44 : vector<16x4xi1>, vector<16x4xf32>
    %46 = vector.extract_strided_slice %27 {offsets = [1, 0], sizes = [1, 4], strides = [1, 1]} : vector<4x4xf32> to vector<1x4xf32>
    %47 = vector.broadcast %46 : vector<1x4xf32> to vector<16x4xf32>
    %48 = arith.mulf %45, %47 : vector<16x4xf32>
    %49 = arith.addf %40, %48 : vector<16x4xf32>
    %c6_i32 = arith.constant 6 : i32
    %50 = tpu.dynamic_rotate %26 by %c6_i32 dim 0 : vector<16x4xf32>, i32 -> vector<16x4xf32>
    %c6_i32_15 = arith.constant 6 : i32
    %51 = vector.broadcast %c6_i32_15 : i32 to vector<16x4xi32>
    %52 = arith.cmpi sge, %28, %51 : vector<16x4xi32>
    %cst_16 = arith.constant 0.000000e+00 : f32
    %53 = vector.broadcast %cst_16 : f32 to vector<16x4xf32>
    %54 = arith.select %52, %50, %53 : vector<16x4xi1>, vector<16x4xf32>
    %55 = vector.extract_strided_slice %27 {offsets = [0, 0], sizes = [1, 4], strides = [1, 1]} : vector<4x4xf32> to vector<1x4xf32>
    %56 = vector.broadcast %55 : vector<1x4xf32> to vector<16x4xf32>
    %57 = arith.mulf %54, %56 : vector<16x4xf32>
    %58 = arith.addf %49, %57 : vector<16x4xf32>
    %c192 = arith.constant 192 : index
    %c0_17 = arith.constant 0 : index
    %59 = vector.load %arg1[%c192, %c0_17] : memref<256x128xf32, #tpu.memory_space<vmem>>, vector<1x4xf32>
    %60 = vector.broadcast %59 : vector<1x4xf32> to vector<16x4xf32>
    %61 = arith.addf %58, %60 : vector<16x4xf32>
    %62 = arith.negf %61 : vector<16x4xf32>
    %63 = math.exp %62 : vector<16x4xf32>
    %cst_18 = arith.constant 1.000000e+00 : f32
    %64 = vector.broadcast %cst_18 : f32 to vector<16x4xf32>
    %65 = arith.addf %64, %63 : vector<16x4xf32>
    %66 = arith.divf %64, %65 : vector<16x4xf32>
    %67 = arith.mulf %61, %66 : vector<16x4xf32>
    %68 = tpu.concatenate %67, %26 in 1 : vector<16x4xf32>, vector<16x4xf32> -> vector<16x8xf32>
    %c16 = arith.constant 16 : index
    %c0_19 = arith.constant 0 : index
    %69 = vector.load %arg1[%c16, %c0_19] : memref<256x128xf32, #tpu.memory_space<vmem>>, vector<8x16xf32>
    %cst_20 = arith.constant dense<0.000000e+00> : vector<16x16xf32>
    %70 = tpu.matmul %68, %69, %cst_20 {dimension_numbers = #tpu.dot_dimension_numbers<[1], [0], [0], [1], [0, 0, 1, 1], [], []>} : vector<16x8xf32>, vector<8x16xf32>, vector<16x16xf32> -> vector<16x16xf32>
    %c24 = arith.constant 24 : index
    %c0_21 = arith.constant 0 : index
    %71 = vector.load %arg1[%c24, %c0_21] : memref<256x128xf32, #tpu.memory_space<vmem>>, vector<4x16xf32>
    %72 = vector.extract_strided_slice %71 {offsets = [0, 0], sizes = [1, 16], strides = [1, 1]} : vector<4x16xf32> to vector<1x16xf32>
    %73 = vector.shape_cast %72 : vector<1x16xf32> to vector<1x16xf32>
    %74 = vector.broadcast %73 : vector<1x16xf32> to vector<2x16xf32>
    %75 = vector.extract_strided_slice %71 {offsets = [1, 0], sizes = [1, 16], strides = [1, 1]} : vector<4x16xf32> to vector<1x16xf32>
    %76 = vector.shape_cast %75 : vector<1x16xf32> to vector<1x16xf32>
    %77 = vector.broadcast %76 : vector<1x16xf32> to vector<2x16xf32>
    %78 = vector.extract_strided_slice %71 {offsets = [2, 0], sizes = [1, 16], strides = [1, 1]} : vector<4x16xf32> to vector<1x16xf32>
    %79 = vector.shape_cast %78 : vector<1x16xf32> to vector<1x16xf32>
    %80 = vector.broadcast %79 : vector<1x16xf32> to vector<2x16xf32>
    %81 = vector.extract_strided_slice %71 {offsets = [3, 0], sizes = [1, 16], strides = [1, 1]} : vector<4x16xf32> to vector<1x16xf32>
    %82 = vector.shape_cast %81 : vector<1x16xf32> to vector<1x16xf32>
    %83 = vector.broadcast %82 : vector<1x16xf32> to vector<2x16xf32>
    %c200 = arith.constant 200 : index
    %c0_22 = arith.constant 0 : index
    %84 = vector.load %arg1[%c200, %c0_22] : memref<256x128xf32, #tpu.memory_space<vmem>>, vector<1x16xf32>
    %85 = vector.shape_cast %84 : vector<1x16xf32> to vector<1x16xf32>
    %86 = vector.broadcast %85 : vector<1x16xf32> to vector<2x16xf32>
    %cst_23 = arith.constant 0.000000e+00 : f32
    %87 = vector.broadcast %cst_23 : f32 to vector<2x4xf32>
    %88 = vector.extract_strided_slice %70 {offsets = [0, 0], sizes = [2, 16], strides = [1, 1]} : vector<16x16xf32> to vector<2x16xf32>
    %89 = arith.addf %88, %86 : vector<2x16xf32>
    %90 = vector.extract_strided_slice %89 {offsets = [0, 0], sizes = [2, 4], strides = [1, 1]} : vector<2x16xf32> to vector<2x4xf32>
    %91 = vector.extract_strided_slice %89 {offsets = [0, 4], sizes = [2, 4], strides = [1, 1]} : vector<2x16xf32> to vector<2x4xf32>
    %92 = vector.extract_strided_slice %89 {offsets = [0, 8], sizes = [2, 4], strides = [1, 1]} : vector<2x16xf32> to vector<2x4xf32>
    %93 = vector.extract_strided_slice %89 {offsets = [0, 12], sizes = [2, 4], strides = [1, 1]} : vector<2x16xf32> to vector<2x4xf32>
    %cst_24 = arith.constant 0.000000e+00 : f32
    %94 = vector.broadcast %cst_24 : f32 to vector<2x4xf32>
    %95 = arith.minimumf %91, %94 : vector<2x4xf32>
    %96 = math.absf %91 : vector<2x4xf32>
    %cst_25 = arith.constant 0.000000e+00 : f32
    %97 = vector.broadcast %cst_25 : f32 to vector<2x4xf32>
    %98 = arith.subf %97, %96 : vector<2x4xf32>
    %99 = math.exp %98 : vector<2x4xf32>
    %cst_26 = arith.constant 1.000000e+00 : f32
    %100 = vector.broadcast %cst_26 : f32 to vector<2x4xf32>
    %101 = arith.addf %100, %99 : vector<2x4xf32>
    %102 = math.log %101 : vector<2x4xf32>
    %103 = arith.subf %95, %102 : vector<2x4xf32>
    %104 = arith.addf %87, %103 : vector<2x4xf32>
    %105 = arith.maximumf %90, %104 : vector<2x4xf32>
    %106 = arith.subf %90, %105 : vector<2x4xf32>
    %107 = math.exp %106 : vector<2x4xf32>
    %108 = arith.subf %104, %105 : vector<2x4xf32>
    %109 = math.exp %108 : vector<2x4xf32>
    %110 = arith.negf %93 : vector<2x4xf32>
    %111 = math.exp %110 : vector<2x4xf32>
    %cst_27 = arith.constant 1.000000e+00 : f32
    %112 = vector.broadcast %cst_27 : f32 to vector<2x4xf32>
    %113 = arith.addf %112, %111 : vector<2x4xf32>
    %114 = arith.divf %112, %113 : vector<2x4xf32>
    %115 = arith.mulf %109, %87 : vector<2x4xf32>
    %116 = math.tanh %92 : vector<2x4xf32>
    %117 = arith.mulf %107, %116 : vector<2x4xf32>
    %118 = arith.addf %115, %117 : vector<2x4xf32>
    %119 = arith.mulf %109, %87 : vector<2x4xf32>
    %120 = arith.addf %119, %107 : vector<2x4xf32>
    %121 = tpu.reciprocal %120 {approx = true} : vector<2x4xf32> -> vector<2x4xf32>
    %122 = arith.mulf %120, %121 : vector<2x4xf32>
    %cst_28 = arith.constant 2.000000e+00 : f32
    %123 = vector.broadcast %cst_28 : f32 to vector<2x4xf32>
    %124 = arith.subf %123, %122 : vector<2x4xf32>
    %125 = arith.mulf %121, %124 : vector<2x4xf32>
    %126 = arith.mulf %114, %118 : vector<2x4xf32>
    %127 = arith.mulf %126, %125 : vector<2x4xf32>
    %128 = vector.extract_strided_slice %127 {offsets = [0, 0], sizes = [2, 1], strides = [1, 1]} : vector<2x4xf32> to vector<2x1xf32>
    %129 = vector.shape_cast %128 : vector<2x1xf32> to vector<2x1xf32>
    %130 = vector.broadcast %129 : vector<2x1xf32> to vector<2x16xf32>
    %131 = arith.mulf %130, %74 : vector<2x16xf32>
    %132 = arith.addf %86, %131 : vector<2x16xf32>
    %133 = vector.extract_strided_slice %127 {offsets = [0, 1], sizes = [2, 1], strides = [1, 1]} : vector<2x4xf32> to vector<2x1xf32>
    %134 = vector.shape_cast %133 : vector<2x1xf32> to vector<2x1xf32>
    %135 = vector.broadcast %134 : vector<2x1xf32> to vector<2x16xf32>
    %136 = arith.mulf %135, %77 : vector<2x16xf32>
    %137 = arith.addf %132, %136 : vector<2x16xf32>
    %138 = vector.extract_strided_slice %127 {offsets = [0, 2], sizes = [2, 1], strides = [1, 1]} : vector<2x4xf32> to vector<2x1xf32>
    %139 = vector.shape_cast %138 : vector<2x1xf32> to vector<2x1xf32>
    %140 = vector.broadcast %139 : vector<2x1xf32> to vector<2x16xf32>
    %141 = arith.mulf %140, %80 : vector<2x16xf32>
    %142 = arith.addf %137, %141 : vector<2x16xf32>
    %143 = vector.extract_strided_slice %127 {offsets = [0, 3], sizes = [2, 1], strides = [1, 1]} : vector<2x4xf32> to vector<2x1xf32>
    %144 = vector.shape_cast %143 : vector<2x1xf32> to vector<2x1xf32>
    %145 = vector.broadcast %144 : vector<2x1xf32> to vector<2x16xf32>
    %146 = arith.mulf %145, %83 : vector<2x16xf32>
    %147 = arith.addf %142, %146 : vector<2x16xf32>
    %148 = vector.extract_strided_slice %70 {offsets = [2, 0], sizes = [2, 16], strides = [1, 1]} : vector<16x16xf32> to vector<2x16xf32>
    %149 = arith.addf %148, %147 : vector<2x16xf32>
    %150 = vector.extract_strided_slice %149 {offsets = [0, 0], sizes = [2, 4], strides = [1, 1]} : vector<2x16xf32> to vector<2x4xf32>
    %151 = vector.extract_strided_slice %149 {offsets = [0, 4], sizes = [2, 4], strides = [1, 1]} : vector<2x16xf32> to vector<2x4xf32>
    %152 = vector.extract_strided_slice %149 {offsets = [0, 8], sizes = [2, 4], strides = [1, 1]} : vector<2x16xf32> to vector<2x4xf32>
    %153 = vector.extract_strided_slice %149 {offsets = [0, 12], sizes = [2, 4], strides = [1, 1]} : vector<2x16xf32> to vector<2x4xf32>
    %cst_29 = arith.constant 0.000000e+00 : f32
    %154 = vector.broadcast %cst_29 : f32 to vector<2x4xf32>
    %155 = arith.minimumf %151, %154 : vector<2x4xf32>
    %156 = math.absf %151 : vector<2x4xf32>
    %cst_30 = arith.constant 0.000000e+00 : f32
    %157 = vector.broadcast %cst_30 : f32 to vector<2x4xf32>
    %158 = arith.subf %157, %156 : vector<2x4xf32>
    %159 = math.exp %158 : vector<2x4xf32>
    %cst_31 = arith.constant 1.000000e+00 : f32
    %160 = vector.broadcast %cst_31 : f32 to vector<2x4xf32>
    %161 = arith.addf %160, %159 : vector<2x4xf32>
    %162 = math.log %161 : vector<2x4xf32>
    %163 = arith.subf %155, %162 : vector<2x4xf32>
    %164 = arith.addf %105, %163 : vector<2x4xf32>
    %165 = arith.maximumf %150, %164 : vector<2x4xf32>
    %166 = arith.subf %150, %165 : vector<2x4xf32>
    %167 = math.exp %166 : vector<2x4xf32>
    %168 = arith.subf %164, %165 : vector<2x4xf32>
    %169 = math.exp %168 : vector<2x4xf32>
    %170 = arith.negf %153 : vector<2x4xf32>
    %171 = math.exp %170 : vector<2x4xf32>
    %cst_32 = arith.constant 1.000000e+00 : f32
    %172 = vector.broadcast %cst_32 : f32 to vector<2x4xf32>
    %173 = arith.addf %172, %171 : vector<2x4xf32>
    %174 = arith.divf %172, %173 : vector<2x4xf32>
    %175 = arith.mulf %169, %118 : vector<2x4xf32>
    %176 = math.tanh %152 : vector<2x4xf32>
    %177 = arith.mulf %167, %176 : vector<2x4xf32>
    %178 = arith.addf %175, %177 : vector<2x4xf32>
    %179 = arith.mulf %169, %120 : vector<2x4xf32>
    %180 = arith.addf %179, %167 : vector<2x4xf32>
    %181 = tpu.reciprocal %180 {approx = true} : vector<2x4xf32> -> vector<2x4xf32>
    %182 = arith.mulf %180, %181 : vector<2x4xf32>
    %cst_33 = arith.constant 2.000000e+00 : f32
    %183 = vector.broadcast %cst_33 : f32 to vector<2x4xf32>
    %184 = arith.subf %183, %182 : vector<2x4xf32>
    %185 = arith.mulf %181, %184 : vector<2x4xf32>
    %186 = arith.mulf %174, %178 : vector<2x4xf32>
    %187 = arith.mulf %186, %185 : vector<2x4xf32>
    %188 = vector.extract_strided_slice %187 {offsets = [0, 0], sizes = [2, 1], strides = [1, 1]} : vector<2x4xf32> to vector<2x1xf32>
    %189 = vector.shape_cast %188 : vector<2x1xf32> to vector<2x1xf32>
    %190 = vector.broadcast %189 : vector<2x1xf32> to vector<2x16xf32>
    %191 = arith.mulf %190, %74 : vector<2x16xf32>
    %192 = arith.addf %86, %191 : vector<2x16xf32>
    %193 = vector.extract_strided_slice %187 {offsets = [0, 1], sizes = [2, 1], strides = [1, 1]} : vector<2x4xf32> to vector<2x1xf32>
    %194 = vector.shape_cast %193 : vector<2x1xf32> to vector<2x1xf32>
    %195 = vector.broadcast %194 : vector<2x1xf32> to vector<2x16xf32>
    %196 = arith.mulf %195, %77 : vector<2x16xf32>
    %197 = arith.addf %192, %196 : vector<2x16xf32>
    %198 = vector.extract_strided_slice %187 {offsets = [0, 2], sizes = [2, 1], strides = [1, 1]} : vector<2x4xf32> to vector<2x1xf32>
    %199 = vector.shape_cast %198 : vector<2x1xf32> to vector<2x1xf32>
    %200 = vector.broadcast %199 : vector<2x1xf32> to vector<2x16xf32>
    %201 = arith.mulf %200, %80 : vector<2x16xf32>
    %202 = arith.addf %197, %201 : vector<2x16xf32>
    %203 = vector.extract_strided_slice %187 {offsets = [0, 3], sizes = [2, 1], strides = [1, 1]} : vector<2x4xf32> to vector<2x1xf32>
    %204 = vector.shape_cast %203 : vector<2x1xf32> to vector<2x1xf32>
    %205 = vector.broadcast %204 : vector<2x1xf32> to vector<2x16xf32>
    %206 = arith.mulf %205, %83 : vector<2x16xf32>
    %207 = arith.addf %202, %206 : vector<2x16xf32>
    %208 = vector.extract_strided_slice %70 {offsets = [4, 0], sizes = [2, 16], strides = [1, 1]} : vector<16x16xf32> to vector<2x16xf32>
    %209 = arith.addf %208, %207 : vector<2x16xf32>
    %210 = vector.extract_strided_slice %209 {offsets = [0, 0], sizes = [2, 4], strides = [1, 1]} : vector<2x16xf32> to vector<2x4xf32>
    %211 = vector.extract_strided_slice %209 {offsets = [0, 4], sizes = [2, 4], strides = [1, 1]} : vector<2x16xf32> to vector<2x4xf32>
    %212 = vector.extract_strided_slice %209 {offsets = [0, 8], sizes = [2, 4], strides = [1, 1]} : vector<2x16xf32> to vector<2x4xf32>
    %213 = vector.extract_strided_slice %209 {offsets = [0, 12], sizes = [2, 4], strides = [1, 1]} : vector<2x16xf32> to vector<2x4xf32>
    %cst_34 = arith.constant 0.000000e+00 : f32
    %214 = vector.broadcast %cst_34 : f32 to vector<2x4xf32>
    %215 = arith.minimumf %211, %214 : vector<2x4xf32>
    %216 = math.absf %211 : vector<2x4xf32>
    %cst_35 = arith.constant 0.000000e+00 : f32
    %217 = vector.broadcast %cst_35 : f32 to vector<2x4xf32>
    %218 = arith.subf %217, %216 : vector<2x4xf32>
    %219 = math.exp %218 : vector<2x4xf32>
    %cst_36 = arith.constant 1.000000e+00 : f32
    %220 = vector.broadcast %cst_36 : f32 to vector<2x4xf32>
    %221 = arith.addf %220, %219 : vector<2x4xf32>
    %222 = math.log %221 : vector<2x4xf32>
    %223 = arith.subf %215, %222 : vector<2x4xf32>
    %224 = arith.addf %165, %223 : vector<2x4xf32>
    %225 = arith.maximumf %210, %224 : vector<2x4xf32>
    %226 = arith.subf %210, %225 : vector<2x4xf32>
    %227 = math.exp %226 : vector<2x4xf32>
    %228 = arith.subf %224, %225 : vector<2x4xf32>
    %229 = math.exp %228 : vector<2x4xf32>
    %230 = arith.negf %213 : vector<2x4xf32>
    %231 = math.exp %230 : vector<2x4xf32>
    %cst_37 = arith.constant 1.000000e+00 : f32
    %232 = vector.broadcast %cst_37 : f32 to vector<2x4xf32>
    %233 = arith.addf %232, %231 : vector<2x4xf32>
    %234 = arith.divf %232, %233 : vector<2x4xf32>
    %235 = arith.mulf %229, %178 : vector<2x4xf32>
    %236 = math.tanh %212 : vector<2x4xf32>
    %237 = arith.mulf %227, %236 : vector<2x4xf32>
    %238 = arith.addf %235, %237 : vector<2x4xf32>
    %239 = arith.mulf %229, %180 : vector<2x4xf32>
    %240 = arith.addf %239, %227 : vector<2x4xf32>
    %241 = tpu.reciprocal %240 {approx = true} : vector<2x4xf32> -> vector<2x4xf32>
    %242 = arith.mulf %240, %241 : vector<2x4xf32>
    %cst_38 = arith.constant 2.000000e+00 : f32
    %243 = vector.broadcast %cst_38 : f32 to vector<2x4xf32>
    %244 = arith.subf %243, %242 : vector<2x4xf32>
    %245 = arith.mulf %241, %244 : vector<2x4xf32>
    %246 = arith.mulf %234, %238 : vector<2x4xf32>
    %247 = arith.mulf %246, %245 : vector<2x4xf32>
    %248 = vector.extract_strided_slice %247 {offsets = [0, 0], sizes = [2, 1], strides = [1, 1]} : vector<2x4xf32> to vector<2x1xf32>
    %249 = vector.shape_cast %248 : vector<2x1xf32> to vector<2x1xf32>
    %250 = vector.broadcast %249 : vector<2x1xf32> to vector<2x16xf32>
    %251 = arith.mulf %250, %74 : vector<2x16xf32>
    %252 = arith.addf %86, %251 : vector<2x16xf32>
    %253 = vector.extract_strided_slice %247 {offsets = [0, 1], sizes = [2, 1], strides = [1, 1]} : vector<2x4xf32> to vector<2x1xf32>
    %254 = vector.shape_cast %253 : vector<2x1xf32> to vector<2x1xf32>
    %255 = vector.broadcast %254 : vector<2x1xf32> to vector<2x16xf32>
    %256 = arith.mulf %255, %77 : vector<2x16xf32>
    %257 = arith.addf %252, %256 : vector<2x16xf32>
    %258 = vector.extract_strided_slice %247 {offsets = [0, 2], sizes = [2, 1], strides = [1, 1]} : vector<2x4xf32> to vector<2x1xf32>
    %259 = vector.shape_cast %258 : vector<2x1xf32> to vector<2x1xf32>
    %260 = vector.broadcast %259 : vector<2x1xf32> to vector<2x16xf32>
    %261 = arith.mulf %260, %80 : vector<2x16xf32>
    %262 = arith.addf %257, %261 : vector<2x16xf32>
    %263 = vector.extract_strided_slice %247 {offsets = [0, 3], sizes = [2, 1], strides = [1, 1]} : vector<2x4xf32> to vector<2x1xf32>
    %264 = vector.shape_cast %263 : vector<2x1xf32> to vector<2x1xf32>
    %265 = vector.broadcast %264 : vector<2x1xf32> to vector<2x16xf32>
    %266 = arith.mulf %265, %83 : vector<2x16xf32>
    %267 = arith.addf %262, %266 : vector<2x16xf32>
    %268 = vector.extract_strided_slice %70 {offsets = [6, 0], sizes = [2, 16], strides = [1, 1]} : vector<16x16xf32> to vector<2x16xf32>
    %269 = arith.addf %268, %267 : vector<2x16xf32>
    %270 = vector.extract_strided_slice %269 {offsets = [0, 0], sizes = [2, 4], strides = [1, 1]} : vector<2x16xf32> to vector<2x4xf32>
    %271 = vector.extract_strided_slice %269 {offsets = [0, 4], sizes = [2, 4], strides = [1, 1]} : vector<2x16xf32> to vector<2x4xf32>
    %272 = vector.extract_strided_slice %269 {offsets = [0, 8], sizes = [2, 4], strides = [1, 1]} : vector<2x16xf32> to vector<2x4xf32>
    %273 = vector.extract_strided_slice %269 {offsets = [0, 12], sizes = [2, 4], strides = [1, 1]} : vector<2x16xf32> to vector<2x4xf32>
    %cst_39 = arith.constant 0.000000e+00 : f32
    %274 = vector.broadcast %cst_39 : f32 to vector<2x4xf32>
    %275 = arith.minimumf %271, %274 : vector<2x4xf32>
    %276 = math.absf %271 : vector<2x4xf32>
    %cst_40 = arith.constant 0.000000e+00 : f32
    %277 = vector.broadcast %cst_40 : f32 to vector<2x4xf32>
    %278 = arith.subf %277, %276 : vector<2x4xf32>
    %279 = math.exp %278 : vector<2x4xf32>
    %cst_41 = arith.constant 1.000000e+00 : f32
    %280 = vector.broadcast %cst_41 : f32 to vector<2x4xf32>
    %281 = arith.addf %280, %279 : vector<2x4xf32>
    %282 = math.log %281 : vector<2x4xf32>
    %283 = arith.subf %275, %282 : vector<2x4xf32>
    %284 = arith.addf %225, %283 : vector<2x4xf32>
    %285 = arith.maximumf %270, %284 : vector<2x4xf32>
    %286 = arith.subf %270, %285 : vector<2x4xf32>
    %287 = math.exp %286 : vector<2x4xf32>
    %288 = arith.subf %284, %285 : vector<2x4xf32>
    %289 = math.exp %288 : vector<2x4xf32>
    %290 = arith.negf %273 : vector<2x4xf32>
    %291 = math.exp %290 : vector<2x4xf32>
    %cst_42 = arith.constant 1.000000e+00 : f32
    %292 = vector.broadcast %cst_42 : f32 to vector<2x4xf32>
    %293 = arith.addf %292, %291 : vector<2x4xf32>
    %294 = arith.divf %292, %293 : vector<2x4xf32>
    %295 = arith.mulf %289, %238 : vector<2x4xf32>
    %296 = math.tanh %272 : vector<2x4xf32>
    %297 = arith.mulf %287, %296 : vector<2x4xf32>
    %298 = arith.addf %295, %297 : vector<2x4xf32>
    %299 = arith.mulf %289, %240 : vector<2x4xf32>
    %300 = arith.addf %299, %287 : vector<2x4xf32>
    %301 = tpu.reciprocal %300 {approx = true} : vector<2x4xf32> -> vector<2x4xf32>
    %302 = arith.mulf %300, %301 : vector<2x4xf32>
    %cst_43 = arith.constant 2.000000e+00 : f32
    %303 = vector.broadcast %cst_43 : f32 to vector<2x4xf32>
    %304 = arith.subf %303, %302 : vector<2x4xf32>
    %305 = arith.mulf %301, %304 : vector<2x4xf32>
    %306 = arith.mulf %294, %298 : vector<2x4xf32>
    %307 = arith.mulf %306, %305 : vector<2x4xf32>
    %308 = vector.extract_strided_slice %307 {offsets = [0, 0], sizes = [2, 1], strides = [1, 1]} : vector<2x4xf32> to vector<2x1xf32>
    %309 = vector.shape_cast %308 : vector<2x1xf32> to vector<2x1xf32>
    %310 = vector.broadcast %309 : vector<2x1xf32> to vector<2x16xf32>
    %311 = arith.mulf %310, %74 : vector<2x16xf32>
    %312 = arith.addf %86, %311 : vector<2x16xf32>
    %313 = vector.extract_strided_slice %307 {offsets = [0, 1], sizes = [2, 1], strides = [1, 1]} : vector<2x4xf32> to vector<2x1xf32>
    %314 = vector.shape_cast %313 : vector<2x1xf32> to vector<2x1xf32>
    %315 = vector.broadcast %314 : vector<2x1xf32> to vector<2x16xf32>
    %316 = arith.mulf %315, %77 : vector<2x16xf32>
    %317 = arith.addf %312, %316 : vector<2x16xf32>
    %318 = vector.extract_strided_slice %307 {offsets = [0, 2], sizes = [2, 1], strides = [1, 1]} : vector<2x4xf32> to vector<2x1xf32>
    %319 = vector.shape_cast %318 : vector<2x1xf32> to vector<2x1xf32>
    %320 = vector.broadcast %319 : vector<2x1xf32> to vector<2x16xf32>
    %321 = arith.mulf %320, %80 : vector<2x16xf32>
    %322 = arith.addf %317, %321 : vector<2x16xf32>
    %323 = vector.extract_strided_slice %307 {offsets = [0, 3], sizes = [2, 1], strides = [1, 1]} : vector<2x4xf32> to vector<2x1xf32>
    %324 = vector.shape_cast %323 : vector<2x1xf32> to vector<2x1xf32>
    %325 = vector.broadcast %324 : vector<2x1xf32> to vector<2x16xf32>
    %326 = arith.mulf %325, %83 : vector<2x16xf32>
    %327 = arith.addf %322, %326 : vector<2x16xf32>
    %328 = vector.extract_strided_slice %70 {offsets = [8, 0], sizes = [2, 16], strides = [1, 1]} : vector<16x16xf32> to vector<2x16xf32>
    %329 = arith.addf %328, %327 : vector<2x16xf32>
    %330 = vector.extract_strided_slice %329 {offsets = [0, 0], sizes = [2, 4], strides = [1, 1]} : vector<2x16xf32> to vector<2x4xf32>
    %331 = vector.extract_strided_slice %329 {offsets = [0, 4], sizes = [2, 4], strides = [1, 1]} : vector<2x16xf32> to vector<2x4xf32>
    %332 = vector.extract_strided_slice %329 {offsets = [0, 8], sizes = [2, 4], strides = [1, 1]} : vector<2x16xf32> to vector<2x4xf32>
    %333 = vector.extract_strided_slice %329 {offsets = [0, 12], sizes = [2, 4], strides = [1, 1]} : vector<2x16xf32> to vector<2x4xf32>
    %cst_44 = arith.constant 0.000000e+00 : f32
    %334 = vector.broadcast %cst_44 : f32 to vector<2x4xf32>
    %335 = arith.minimumf %331, %334 : vector<2x4xf32>
    %336 = math.absf %331 : vector<2x4xf32>
    %cst_45 = arith.constant 0.000000e+00 : f32
    %337 = vector.broadcast %cst_45 : f32 to vector<2x4xf32>
    %338 = arith.subf %337, %336 : vector<2x4xf32>
    %339 = math.exp %338 : vector<2x4xf32>
    %cst_46 = arith.constant 1.000000e+00 : f32
    %340 = vector.broadcast %cst_46 : f32 to vector<2x4xf32>
    %341 = arith.addf %340, %339 : vector<2x4xf32>
    %342 = math.log %341 : vector<2x4xf32>
    %343 = arith.subf %335, %342 : vector<2x4xf32>
    %344 = arith.addf %285, %343 : vector<2x4xf32>
    %345 = arith.maximumf %330, %344 : vector<2x4xf32>
    %346 = arith.subf %330, %345 : vector<2x4xf32>
    %347 = math.exp %346 : vector<2x4xf32>
    %348 = arith.subf %344, %345 : vector<2x4xf32>
    %349 = math.exp %348 : vector<2x4xf32>
    %350 = arith.negf %333 : vector<2x4xf32>
    %351 = math.exp %350 : vector<2x4xf32>
    %cst_47 = arith.constant 1.000000e+00 : f32
    %352 = vector.broadcast %cst_47 : f32 to vector<2x4xf32>
    %353 = arith.addf %352, %351 : vector<2x4xf32>
    %354 = arith.divf %352, %353 : vector<2x4xf32>
    %355 = arith.mulf %349, %298 : vector<2x4xf32>
    %356 = math.tanh %332 : vector<2x4xf32>
    %357 = arith.mulf %347, %356 : vector<2x4xf32>
    %358 = arith.addf %355, %357 : vector<2x4xf32>
    %359 = arith.mulf %349, %300 : vector<2x4xf32>
    %360 = arith.addf %359, %347 : vector<2x4xf32>
    %361 = tpu.reciprocal %360 {approx = true} : vector<2x4xf32> -> vector<2x4xf32>
    %362 = arith.mulf %360, %361 : vector<2x4xf32>
    %cst_48 = arith.constant 2.000000e+00 : f32
    %363 = vector.broadcast %cst_48 : f32 to vector<2x4xf32>
    %364 = arith.subf %363, %362 : vector<2x4xf32>
    %365 = arith.mulf %361, %364 : vector<2x4xf32>
    %366 = arith.mulf %354, %358 : vector<2x4xf32>
    %367 = arith.mulf %366, %365 : vector<2x4xf32>
    %368 = vector.extract_strided_slice %367 {offsets = [0, 0], sizes = [2, 1], strides = [1, 1]} : vector<2x4xf32> to vector<2x1xf32>
    %369 = vector.shape_cast %368 : vector<2x1xf32> to vector<2x1xf32>
    %370 = vector.broadcast %369 : vector<2x1xf32> to vector<2x16xf32>
    %371 = arith.mulf %370, %74 : vector<2x16xf32>
    %372 = arith.addf %86, %371 : vector<2x16xf32>
    %373 = vector.extract_strided_slice %367 {offsets = [0, 1], sizes = [2, 1], strides = [1, 1]} : vector<2x4xf32> to vector<2x1xf32>
    %374 = vector.shape_cast %373 : vector<2x1xf32> to vector<2x1xf32>
    %375 = vector.broadcast %374 : vector<2x1xf32> to vector<2x16xf32>
    %376 = arith.mulf %375, %77 : vector<2x16xf32>
    %377 = arith.addf %372, %376 : vector<2x16xf32>
    %378 = vector.extract_strided_slice %367 {offsets = [0, 2], sizes = [2, 1], strides = [1, 1]} : vector<2x4xf32> to vector<2x1xf32>
    %379 = vector.shape_cast %378 : vector<2x1xf32> to vector<2x1xf32>
    %380 = vector.broadcast %379 : vector<2x1xf32> to vector<2x16xf32>
    %381 = arith.mulf %380, %80 : vector<2x16xf32>
    %382 = arith.addf %377, %381 : vector<2x16xf32>
    %383 = vector.extract_strided_slice %367 {offsets = [0, 3], sizes = [2, 1], strides = [1, 1]} : vector<2x4xf32> to vector<2x1xf32>
    %384 = vector.shape_cast %383 : vector<2x1xf32> to vector<2x1xf32>
    %385 = vector.broadcast %384 : vector<2x1xf32> to vector<2x16xf32>
    %386 = arith.mulf %385, %83 : vector<2x16xf32>
    %387 = arith.addf %382, %386 : vector<2x16xf32>
    %388 = vector.extract_strided_slice %70 {offsets = [10, 0], sizes = [2, 16], strides = [1, 1]} : vector<16x16xf32> to vector<2x16xf32>
    %389 = arith.addf %388, %387 : vector<2x16xf32>
    %390 = vector.extract_strided_slice %389 {offsets = [0, 0], sizes = [2, 4], strides = [1, 1]} : vector<2x16xf32> to vector<2x4xf32>
    %391 = vector.extract_strided_slice %389 {offsets = [0, 4], sizes = [2, 4], strides = [1, 1]} : vector<2x16xf32> to vector<2x4xf32>
    %392 = vector.extract_strided_slice %389 {offsets = [0, 8], sizes = [2, 4], strides = [1, 1]} : vector<2x16xf32> to vector<2x4xf32>
    %393 = vector.extract_strided_slice %389 {offsets = [0, 12], sizes = [2, 4], strides = [1, 1]} : vector<2x16xf32> to vector<2x4xf32>
    %cst_49 = arith.constant 0.000000e+00 : f32
    %394 = vector.broadcast %cst_49 : f32 to vector<2x4xf32>
    %395 = arith.minimumf %391, %394 : vector<2x4xf32>
    %396 = math.absf %391 : vector<2x4xf32>
    %cst_50 = arith.constant 0.000000e+00 : f32
    %397 = vector.broadcast %cst_50 : f32 to vector<2x4xf32>
    %398 = arith.subf %397, %396 : vector<2x4xf32>
    %399 = math.exp %398 : vector<2x4xf32>
    %cst_51 = arith.constant 1.000000e+00 : f32
    %400 = vector.broadcast %cst_51 : f32 to vector<2x4xf32>
    %401 = arith.addf %400, %399 : vector<2x4xf32>
    %402 = math.log %401 : vector<2x4xf32>
    %403 = arith.subf %395, %402 : vector<2x4xf32>
    %404 = arith.addf %345, %403 : vector<2x4xf32>
    %405 = arith.maximumf %390, %404 : vector<2x4xf32>
    %406 = arith.subf %390, %405 : vector<2x4xf32>
    %407 = math.exp %406 : vector<2x4xf32>
    %408 = arith.subf %404, %405 : vector<2x4xf32>
    %409 = math.exp %408 : vector<2x4xf32>
    %410 = arith.negf %393 : vector<2x4xf32>
    %411 = math.exp %410 : vector<2x4xf32>
    %cst_52 = arith.constant 1.000000e+00 : f32
    %412 = vector.broadcast %cst_52 : f32 to vector<2x4xf32>
    %413 = arith.addf %412, %411 : vector<2x4xf32>
    %414 = arith.divf %412, %413 : vector<2x4xf32>
    %415 = arith.mulf %409, %358 : vector<2x4xf32>
    %416 = math.tanh %392 : vector<2x4xf32>
    %417 = arith.mulf %407, %416 : vector<2x4xf32>
    %418 = arith.addf %415, %417 : vector<2x4xf32>
    %419 = arith.mulf %409, %360 : vector<2x4xf32>
    %420 = arith.addf %419, %407 : vector<2x4xf32>
    %421 = tpu.reciprocal %420 {approx = true} : vector<2x4xf32> -> vector<2x4xf32>
    %422 = arith.mulf %420, %421 : vector<2x4xf32>
    %cst_53 = arith.constant 2.000000e+00 : f32
    %423 = vector.broadcast %cst_53 : f32 to vector<2x4xf32>
    %424 = arith.subf %423, %422 : vector<2x4xf32>
    %425 = arith.mulf %421, %424 : vector<2x4xf32>
    %426 = arith.mulf %414, %418 : vector<2x4xf32>
    %427 = arith.mulf %426, %425 : vector<2x4xf32>
    %428 = vector.extract_strided_slice %427 {offsets = [0, 0], sizes = [2, 1], strides = [1, 1]} : vector<2x4xf32> to vector<2x1xf32>
    %429 = vector.shape_cast %428 : vector<2x1xf32> to vector<2x1xf32>
    %430 = vector.broadcast %429 : vector<2x1xf32> to vector<2x16xf32>
    %431 = arith.mulf %430, %74 : vector<2x16xf32>
    %432 = arith.addf %86, %431 : vector<2x16xf32>
    %433 = vector.extract_strided_slice %427 {offsets = [0, 1], sizes = [2, 1], strides = [1, 1]} : vector<2x4xf32> to vector<2x1xf32>
    %434 = vector.shape_cast %433 : vector<2x1xf32> to vector<2x1xf32>
    %435 = vector.broadcast %434 : vector<2x1xf32> to vector<2x16xf32>
    %436 = arith.mulf %435, %77 : vector<2x16xf32>
    %437 = arith.addf %432, %436 : vector<2x16xf32>
    %438 = vector.extract_strided_slice %427 {offsets = [0, 2], sizes = [2, 1], strides = [1, 1]} : vector<2x4xf32> to vector<2x1xf32>
    %439 = vector.shape_cast %438 : vector<2x1xf32> to vector<2x1xf32>
    %440 = vector.broadcast %439 : vector<2x1xf32> to vector<2x16xf32>
    %441 = arith.mulf %440, %80 : vector<2x16xf32>
    %442 = arith.addf %437, %441 : vector<2x16xf32>
    %443 = vector.extract_strided_slice %427 {offsets = [0, 3], sizes = [2, 1], strides = [1, 1]} : vector<2x4xf32> to vector<2x1xf32>
    %444 = vector.shape_cast %443 : vector<2x1xf32> to vector<2x1xf32>
    %445 = vector.broadcast %444 : vector<2x1xf32> to vector<2x16xf32>
    %446 = arith.mulf %445, %83 : vector<2x16xf32>
    %447 = arith.addf %442, %446 : vector<2x16xf32>
    %448 = vector.extract_strided_slice %70 {offsets = [12, 0], sizes = [2, 16], strides = [1, 1]} : vector<16x16xf32> to vector<2x16xf32>
    %449 = arith.addf %448, %447 : vector<2x16xf32>
    %450 = vector.extract_strided_slice %449 {offsets = [0, 0], sizes = [2, 4], strides = [1, 1]} : vector<2x16xf32> to vector<2x4xf32>
    %451 = vector.extract_strided_slice %449 {offsets = [0, 4], sizes = [2, 4], strides = [1, 1]} : vector<2x16xf32> to vector<2x4xf32>
    %452 = vector.extract_strided_slice %449 {offsets = [0, 8], sizes = [2, 4], strides = [1, 1]} : vector<2x16xf32> to vector<2x4xf32>
    %453 = vector.extract_strided_slice %449 {offsets = [0, 12], sizes = [2, 4], strides = [1, 1]} : vector<2x16xf32> to vector<2x4xf32>
    %cst_54 = arith.constant 0.000000e+00 : f32
    %454 = vector.broadcast %cst_54 : f32 to vector<2x4xf32>
    %455 = arith.minimumf %451, %454 : vector<2x4xf32>
    %456 = math.absf %451 : vector<2x4xf32>
    %cst_55 = arith.constant 0.000000e+00 : f32
    %457 = vector.broadcast %cst_55 : f32 to vector<2x4xf32>
    %458 = arith.subf %457, %456 : vector<2x4xf32>
    %459 = math.exp %458 : vector<2x4xf32>
    %cst_56 = arith.constant 1.000000e+00 : f32
    %460 = vector.broadcast %cst_56 : f32 to vector<2x4xf32>
    %461 = arith.addf %460, %459 : vector<2x4xf32>
    %462 = math.log %461 : vector<2x4xf32>
    %463 = arith.subf %455, %462 : vector<2x4xf32>
    %464 = arith.addf %405, %463 : vector<2x4xf32>
    %465 = arith.maximumf %450, %464 : vector<2x4xf32>
    %466 = arith.subf %450, %465 : vector<2x4xf32>
    %467 = math.exp %466 : vector<2x4xf32>
    %468 = arith.subf %464, %465 : vector<2x4xf32>
    %469 = math.exp %468 : vector<2x4xf32>
    %470 = arith.negf %453 : vector<2x4xf32>
    %471 = math.exp %470 : vector<2x4xf32>
    %cst_57 = arith.constant 1.000000e+00 : f32
    %472 = vector.broadcast %cst_57 : f32 to vector<2x4xf32>
    %473 = arith.addf %472, %471 : vector<2x4xf32>
    %474 = arith.divf %472, %473 : vector<2x4xf32>
    %475 = arith.mulf %469, %418 : vector<2x4xf32>
    %476 = math.tanh %452 : vector<2x4xf32>
    %477 = arith.mulf %467, %476 : vector<2x4xf32>
    %478 = arith.addf %475, %477 : vector<2x4xf32>
    %479 = arith.mulf %469, %420 : vector<2x4xf32>
    %480 = arith.addf %479, %467 : vector<2x4xf32>
    %481 = tpu.reciprocal %480 {approx = true} : vector<2x4xf32> -> vector<2x4xf32>
    %482 = arith.mulf %480, %481 : vector<2x4xf32>
    %cst_58 = arith.constant 2.000000e+00 : f32
    %483 = vector.broadcast %cst_58 : f32 to vector<2x4xf32>
    %484 = arith.subf %483, %482 : vector<2x4xf32>
    %485 = arith.mulf %481, %484 : vector<2x4xf32>
    %486 = arith.mulf %474, %478 : vector<2x4xf32>
    %487 = arith.mulf %486, %485 : vector<2x4xf32>
    %488 = vector.extract_strided_slice %487 {offsets = [0, 0], sizes = [2, 1], strides = [1, 1]} : vector<2x4xf32> to vector<2x1xf32>
    %489 = vector.shape_cast %488 : vector<2x1xf32> to vector<2x1xf32>
    %490 = vector.broadcast %489 : vector<2x1xf32> to vector<2x16xf32>
    %491 = arith.mulf %490, %74 : vector<2x16xf32>
    %492 = arith.addf %86, %491 : vector<2x16xf32>
    %493 = vector.extract_strided_slice %487 {offsets = [0, 1], sizes = [2, 1], strides = [1, 1]} : vector<2x4xf32> to vector<2x1xf32>
    %494 = vector.shape_cast %493 : vector<2x1xf32> to vector<2x1xf32>
    %495 = vector.broadcast %494 : vector<2x1xf32> to vector<2x16xf32>
    %496 = arith.mulf %495, %77 : vector<2x16xf32>
    %497 = arith.addf %492, %496 : vector<2x16xf32>
    %498 = vector.extract_strided_slice %487 {offsets = [0, 2], sizes = [2, 1], strides = [1, 1]} : vector<2x4xf32> to vector<2x1xf32>
    %499 = vector.shape_cast %498 : vector<2x1xf32> to vector<2x1xf32>
    %500 = vector.broadcast %499 : vector<2x1xf32> to vector<2x16xf32>
    %501 = arith.mulf %500, %80 : vector<2x16xf32>
    %502 = arith.addf %497, %501 : vector<2x16xf32>
    %503 = vector.extract_strided_slice %487 {offsets = [0, 3], sizes = [2, 1], strides = [1, 1]} : vector<2x4xf32> to vector<2x1xf32>
    %504 = vector.shape_cast %503 : vector<2x1xf32> to vector<2x1xf32>
    %505 = vector.broadcast %504 : vector<2x1xf32> to vector<2x16xf32>
    %506 = arith.mulf %505, %83 : vector<2x16xf32>
    %507 = arith.addf %502, %506 : vector<2x16xf32>
    %508 = vector.extract_strided_slice %70 {offsets = [14, 0], sizes = [2, 16], strides = [1, 1]} : vector<16x16xf32> to vector<2x16xf32>
    %509 = arith.addf %508, %507 : vector<2x16xf32>
    %510 = vector.extract_strided_slice %509 {offsets = [0, 0], sizes = [2, 4], strides = [1, 1]} : vector<2x16xf32> to vector<2x4xf32>
    %511 = vector.extract_strided_slice %509 {offsets = [0, 4], sizes = [2, 4], strides = [1, 1]} : vector<2x16xf32> to vector<2x4xf32>
    %512 = vector.extract_strided_slice %509 {offsets = [0, 8], sizes = [2, 4], strides = [1, 1]} : vector<2x16xf32> to vector<2x4xf32>
    %513 = vector.extract_strided_slice %509 {offsets = [0, 12], sizes = [2, 4], strides = [1, 1]} : vector<2x16xf32> to vector<2x4xf32>
    %cst_59 = arith.constant 0.000000e+00 : f32
    %514 = vector.broadcast %cst_59 : f32 to vector<2x4xf32>
    %515 = arith.minimumf %511, %514 : vector<2x4xf32>
    %516 = math.absf %511 : vector<2x4xf32>
    %cst_60 = arith.constant 0.000000e+00 : f32
    %517 = vector.broadcast %cst_60 : f32 to vector<2x4xf32>
    %518 = arith.subf %517, %516 : vector<2x4xf32>
    %519 = math.exp %518 : vector<2x4xf32>
    %cst_61 = arith.constant 1.000000e+00 : f32
    %520 = vector.broadcast %cst_61 : f32 to vector<2x4xf32>
    %521 = arith.addf %520, %519 : vector<2x4xf32>
    %522 = math.log %521 : vector<2x4xf32>
    %523 = arith.subf %515, %522 : vector<2x4xf32>
    %524 = arith.addf %465, %523 : vector<2x4xf32>
    %525 = arith.maximumf %510, %524 : vector<2x4xf32>
    %526 = arith.subf %510, %525 : vector<2x4xf32>
    %527 = math.exp %526 : vector<2x4xf32>
    %528 = arith.subf %524, %525 : vector<2x4xf32>
    %529 = math.exp %528 : vector<2x4xf32>
    %530 = arith.negf %513 : vector<2x4xf32>
    %531 = math.exp %530 : vector<2x4xf32>
    %cst_62 = arith.constant 1.000000e+00 : f32
    %532 = vector.broadcast %cst_62 : f32 to vector<2x4xf32>
    %533 = arith.addf %532, %531 : vector<2x4xf32>
    %534 = arith.divf %532, %533 : vector<2x4xf32>
    %535 = arith.mulf %529, %478 : vector<2x4xf32>
    %536 = math.tanh %512 : vector<2x4xf32>
    %537 = arith.mulf %527, %536 : vector<2x4xf32>
    %538 = arith.addf %535, %537 : vector<2x4xf32>
    %539 = arith.mulf %529, %480 : vector<2x4xf32>
    %540 = arith.addf %539, %527 : vector<2x4xf32>
    %541 = tpu.reciprocal %540 {approx = true} : vector<2x4xf32> -> vector<2x4xf32>
    %542 = arith.mulf %540, %541 : vector<2x4xf32>
    %cst_63 = arith.constant 2.000000e+00 : f32
    %543 = vector.broadcast %cst_63 : f32 to vector<2x4xf32>
    %544 = arith.subf %543, %542 : vector<2x4xf32>
    %545 = arith.mulf %541, %544 : vector<2x4xf32>
    %546 = arith.mulf %534, %538 : vector<2x4xf32>
    %547 = arith.mulf %546, %545 : vector<2x4xf32>
    %548 = tpu.concatenate %127, %187, %247, %307, %367, %427, %487, %547 in 0 : vector<2x4xf32>, vector<2x4xf32>, vector<2x4xf32>, vector<2x4xf32>, vector<2x4xf32>, vector<2x4xf32>, vector<2x4xf32>, vector<2x4xf32> -> vector<16x4xf32>
    %549 = vector.extract_strided_slice %548 {offsets = [0, 0], sizes = [16, 2], strides = [1, 1]} : vector<16x4xf32> to vector<16x2xf32>
    %cst_64 = arith.constant dense<0.000000e+00> : vector<16xf32>
    %550 = vector.multi_reduction <add>, %549, %cst_64 [1] : vector<16x2xf32> to vector<16xf32>
    %551 = vector.shape_cast %550 : vector<16xf32> to vector<16x1xf32>
    %cst_65 = arith.constant 2.000000e+00 : f32
    %552 = vector.broadcast %cst_65 : f32 to vector<16x1xf32>
    %553 = arith.divf %551, %552 : vector<16x1xf32>
    %554 = vector.broadcast %553 : vector<16x1xf32> to vector<16x2xf32>
    %555 = arith.subf %549, %554 : vector<16x2xf32>
    %556 = arith.mulf %555, %555 : vector<16x2xf32>
    %cst_66 = arith.constant dense<0.000000e+00> : vector<16xf32>
    %557 = vector.multi_reduction <add>, %556, %cst_66 [1] : vector<16x2xf32> to vector<16xf32>
    %558 = vector.shape_cast %557 : vector<16xf32> to vector<16x1xf32>
    %cst_67 = arith.constant 2.000000e+00 : f32
    %559 = vector.broadcast %cst_67 : f32 to vector<16x1xf32>
    %560 = arith.divf %558, %559 : vector<16x1xf32>
    %561 = vector.broadcast %553 : vector<16x1xf32> to vector<16x2xf32>
    %562 = arith.subf %549, %561 : vector<16x2xf32>
    %cst_68 = arith.constant 9.99999974E-6 : f32
    %563 = vector.broadcast %cst_68 : f32 to vector<16x1xf32>
    %564 = arith.addf %560, %563 : vector<16x1xf32>
    %565 = math.rsqrt %564 : vector<16x1xf32>
    %566 = vector.broadcast %565 : vector<16x1xf32> to vector<16x2xf32>
    %567 = arith.mulf %562, %566 : vector<16x2xf32>
    %568 = vector.extract_strided_slice %548 {offsets = [0, 2], sizes = [16, 2], strides = [1, 1]} : vector<16x4xf32> to vector<16x2xf32>
    %cst_69 = arith.constant dense<0.000000e+00> : vector<16xf32>
    %569 = vector.multi_reduction <add>, %568, %cst_69 [1] : vector<16x2xf32> to vector<16xf32>
    %570 = vector.shape_cast %569 : vector<16xf32> to vector<16x1xf32>
    %cst_70 = arith.constant 2.000000e+00 : f32
    %571 = vector.broadcast %cst_70 : f32 to vector<16x1xf32>
    %572 = arith.divf %570, %571 : vector<16x1xf32>
    %573 = vector.broadcast %572 : vector<16x1xf32> to vector<16x2xf32>
    %574 = arith.subf %568, %573 : vector<16x2xf32>
    %575 = arith.mulf %574, %574 : vector<16x2xf32>
    %cst_71 = arith.constant dense<0.000000e+00> : vector<16xf32>
    %576 = vector.multi_reduction <add>, %575, %cst_71 [1] : vector<16x2xf32> to vector<16xf32>
    %577 = vector.shape_cast %576 : vector<16xf32> to vector<16x1xf32>
    %cst_72 = arith.constant 2.000000e+00 : f32
    %578 = vector.broadcast %cst_72 : f32 to vector<16x1xf32>
    %579 = arith.divf %577, %578 : vector<16x1xf32>
    %580 = vector.broadcast %572 : vector<16x1xf32> to vector<16x2xf32>
    %581 = arith.subf %568, %580 : vector<16x2xf32>
    %cst_73 = arith.constant 9.99999974E-6 : f32
    %582 = vector.broadcast %cst_73 : f32 to vector<16x1xf32>
    %583 = arith.addf %579, %582 : vector<16x1xf32>
    %584 = math.rsqrt %583 : vector<16x1xf32>
    %585 = vector.broadcast %584 : vector<16x1xf32> to vector<16x2xf32>
    %586 = arith.mulf %581, %585 : vector<16x2xf32>
    %587 = tpu.concatenate %567, %586 in 1 : vector<16x2xf32>, vector<16x2xf32> -> vector<16x4xf32>
    %c208 = arith.constant 208 : index
    %c0_74 = arith.constant 0 : index
    %588 = vector.load %arg1[%c208, %c0_74] : memref<256x128xf32, #tpu.memory_space<vmem>>, vector<1x4xf32>
    %589 = vector.broadcast %588 : vector<1x4xf32> to vector<16x4xf32>
    %590 = arith.mulf %587, %589 : vector<16x4xf32>
    %591 = arith.addf %5, %590 : vector<16x4xf32>
    %c216 = arith.constant 216 : index
    %c0_75 = arith.constant 0 : index
    %592 = vector.load %arg1[%c216, %c0_75] : memref<256x128xf32, #tpu.memory_space<vmem>>, vector<1x4xf32>
    %cst_76 = arith.constant dense<0.000000e+00> : vector<16xf32>
    %593 = vector.multi_reduction <add>, %591, %cst_76 [1] : vector<16x4xf32> to vector<16xf32>
    %594 = vector.shape_cast %593 : vector<16xf32> to vector<16x1xf32>
    %cst_77 = arith.constant 4.000000e+00 : f32
    %595 = vector.broadcast %cst_77 : f32 to vector<16x1xf32>
    %596 = arith.divf %594, %595 : vector<16x1xf32>
    %597 = vector.broadcast %596 : vector<16x1xf32> to vector<16x4xf32>
    %598 = arith.subf %591, %597 : vector<16x4xf32>
    %599 = arith.mulf %598, %598 : vector<16x4xf32>
    %cst_78 = arith.constant dense<0.000000e+00> : vector<16xf32>
    %600 = vector.multi_reduction <add>, %599, %cst_78 [1] : vector<16x4xf32> to vector<16xf32>
    %601 = vector.shape_cast %600 : vector<16xf32> to vector<16x1xf32>
    %cst_79 = arith.constant 4.000000e+00 : f32
    %602 = vector.broadcast %cst_79 : f32 to vector<16x1xf32>
    %603 = arith.divf %601, %602 : vector<16x1xf32>
    %604 = vector.broadcast %596 : vector<16x1xf32> to vector<16x4xf32>
    %605 = arith.subf %591, %604 : vector<16x4xf32>
    %cst_80 = arith.constant 9.99999974E-6 : f32
    %606 = vector.broadcast %cst_80 : f32 to vector<16x1xf32>
    %607 = arith.addf %603, %606 : vector<16x1xf32>
    %608 = math.rsqrt %607 : vector<16x1xf32>
    %609 = vector.broadcast %608 : vector<16x1xf32> to vector<16x4xf32>
    %610 = arith.mulf %605, %609 : vector<16x4xf32>
    %611 = vector.broadcast %592 : vector<1x4xf32> to vector<16x4xf32>
    %612 = arith.mulf %610, %611 : vector<16x4xf32>
    %c32 = arith.constant 32 : index
    %c0_81 = arith.constant 0 : index
    %613 = vector.load %arg1[%c32, %c0_81] : memref<256x128xf32, #tpu.memory_space<vmem>>, vector<4x64xf32>
    %cst_82 = arith.constant dense<0.000000e+00> : vector<16x64xf32>
    %614 = tpu.matmul %612, %613, %cst_82 {dimension_numbers = #tpu.dot_dimension_numbers<[1], [0], [0], [1], [0, 0, 1, 1], [], []>} : vector<16x4xf32>, vector<4x64xf32>, vector<16x64xf32> -> vector<16x64xf32>
    %c40 = arith.constant 40 : index
    %c0_83 = arith.constant 0 : index
    %615 = vector.load %arg1[%c40, %c0_83] : memref<256x128xf32, #tpu.memory_space<vmem>>, vector<4x64xf32>
    %cst_84 = arith.constant dense<0.000000e+00> : vector<16x64xf32>
    %616 = tpu.matmul %612, %615, %cst_84 {dimension_numbers = #tpu.dot_dimension_numbers<[1], [0], [0], [1], [0, 0, 1, 1], [], []>} : vector<16x4xf32>, vector<4x64xf32>, vector<16x64xf32> -> vector<16x64xf32>
    %617 = arith.mulf %614, %614 : vector<16x64xf32>
    %618 = arith.mulf %614, %617 : vector<16x64xf32>
    %cst_85 = arith.constant 4.471500e-02 : f32
    %619 = vector.broadcast %cst_85 : f32 to vector<16x64xf32>
    %620 = arith.mulf %619, %618 : vector<16x64xf32>
    %621 = arith.addf %614, %620 : vector<16x64xf32>
    %cst_86 = arith.constant 0.797884583 : f32
    %622 = vector.broadcast %cst_86 : f32 to vector<16x64xf32>
    %623 = arith.mulf %622, %621 : vector<16x64xf32>
    %624 = math.tanh %623 : vector<16x64xf32>
    %cst_87 = arith.constant 1.000000e+00 : f32
    %625 = vector.broadcast %cst_87 : f32 to vector<16x64xf32>
    %626 = arith.addf %625, %624 : vector<16x64xf32>
    %cst_88 = arith.constant 5.000000e-01 : f32
    %627 = vector.broadcast %cst_88 : f32 to vector<16x64xf32>
    %628 = arith.mulf %627, %626 : vector<16x64xf32>
    %629 = arith.mulf %614, %628 : vector<16x64xf32>
    %630 = arith.mulf %629, %616 : vector<16x64xf32>
    %c48 = arith.constant 48 : index
    %c0_89 = arith.constant 0 : index
    %631 = vector.load %arg1[%c48, %c0_89] : memref<256x128xf32, #tpu.memory_space<vmem>>, vector<64x4xf32>
    %cst_90 = arith.constant dense<0.000000e+00> : vector<16x4xf32>
    %632 = tpu.matmul %630, %631, %cst_90 {dimension_numbers = #tpu.dot_dimension_numbers<[1], [0], [0], [1], [0, 0, 1, 1], [], []>} : vector<16x64xf32>, vector<64x4xf32>, vector<16x4xf32> -> vector<16x4xf32>
    %633 = arith.addf %591, %632 : vector<16x4xf32>
    %c224 = arith.constant 224 : index
    %c0_91 = arith.constant 0 : index
    %634 = vector.load %arg1[%c224, %c0_91] : memref<256x128xf32, #tpu.memory_space<vmem>>, vector<1x4xf32>
    %cst_92 = arith.constant dense<0.000000e+00> : vector<16xf32>
    %635 = vector.multi_reduction <add>, %633, %cst_92 [1] : vector<16x4xf32> to vector<16xf32>
    %636 = vector.shape_cast %635 : vector<16xf32> to vector<16x1xf32>
    %cst_93 = arith.constant 4.000000e+00 : f32
    %637 = vector.broadcast %cst_93 : f32 to vector<16x1xf32>
    %638 = arith.divf %636, %637 : vector<16x1xf32>
    %639 = vector.broadcast %638 : vector<16x1xf32> to vector<16x4xf32>
    %640 = arith.subf %633, %639 : vector<16x4xf32>
    %641 = arith.mulf %640, %640 : vector<16x4xf32>
    %cst_94 = arith.constant dense<0.000000e+00> : vector<16xf32>
    %642 = vector.multi_reduction <add>, %641, %cst_94 [1] : vector<16x4xf32> to vector<16xf32>
    %643 = vector.shape_cast %642 : vector<16xf32> to vector<16x1xf32>
    %cst_95 = arith.constant 4.000000e+00 : f32
    %644 = vector.broadcast %cst_95 : f32 to vector<16x1xf32>
    %645 = arith.divf %643, %644 : vector<16x1xf32>
    %646 = vector.broadcast %638 : vector<16x1xf32> to vector<16x4xf32>
    %647 = arith.subf %633, %646 : vector<16x4xf32>
    %cst_96 = arith.constant 9.99999974E-6 : f32
    %648 = vector.broadcast %cst_96 : f32 to vector<16x1xf32>
    %649 = arith.addf %645, %648 : vector<16x1xf32>
    %650 = math.rsqrt %649 : vector<16x1xf32>
    %651 = vector.broadcast %650 : vector<16x1xf32> to vector<16x4xf32>
    %652 = arith.mulf %647, %651 : vector<16x4xf32>
    %653 = vector.broadcast %634 : vector<1x4xf32> to vector<16x4xf32>
    %654 = arith.mulf %652, %653 : vector<16x4xf32>
    %c112 = arith.constant 112 : index
    %c0_97 = arith.constant 0 : index
    %655 = vector.load %arg1[%c112, %c0_97] : memref<256x128xf32, #tpu.memory_space<vmem>>, vector<4x30xf32>
    %cst_98 = arith.constant dense<0.000000e+00> : vector<16x30xf32>
    %656 = tpu.matmul %654, %655, %cst_98 {dimension_numbers = #tpu.dot_dimension_numbers<[1], [0], [0], [1], [0, 0, 1, 1], [], []>} : vector<16x4xf32>, vector<4x30xf32>, vector<16x30xf32> -> vector<16x30xf32>
    %c232 = arith.constant 232 : index
    %c0_99 = arith.constant 0 : index
    %657 = vector.load %arg1[%c232, %c0_99] : memref<256x128xf32, #tpu.memory_space<vmem>>, vector<1x30xf32>
    %658 = vector.broadcast %657 : vector<1x30xf32> to vector<16x30xf32>
    %659 = arith.addf %656, %658 : vector<16x30xf32>
    %cst_100 = arith.constant 0.000000e+00 : f32
    %660 = vector.broadcast %cst_100 : f32 to vector<16x30xf32>
    %661 = arith.maximumf %659, %660 : vector<16x30xf32>
    %c120 = arith.constant 120 : index
    %c0_101 = arith.constant 0 : index
    %662 = vector.load %arg1[%c120, %c0_101] : memref<256x128xf32, #tpu.memory_space<vmem>>, vector<30x20xf32>
    %cst_102 = arith.constant dense<0.000000e+00> : vector<16x20xf32>
    %663 = tpu.matmul %661, %662, %cst_102 {dimension_numbers = #tpu.dot_dimension_numbers<[1], [0], [0], [1], [0, 0, 1, 1], [], []>} : vector<16x30xf32>, vector<30x20xf32>, vector<16x20xf32> -> vector<16x20xf32>
    %c240 = arith.constant 240 : index
    %c0_103 = arith.constant 0 : index
    %664 = vector.load %arg1[%c240, %c0_103] : memref<256x128xf32, #tpu.memory_space<vmem>>, vector<1x20xf32>
    %665 = vector.broadcast %664 : vector<1x20xf32> to vector<16x20xf32>
    %666 = arith.addf %663, %665 : vector<16x20xf32>
    %cst_104 = arith.constant 0.000000e+00 : f32
    %667 = vector.broadcast %cst_104 : f32 to vector<16x20xf32>
    %668 = arith.maximumf %666, %667 : vector<16x20xf32>
    %c152 = arith.constant 152 : index
    %c0_105 = arith.constant 0 : index
    %669 = vector.load %arg1[%c152, %c0_105] : memref<256x128xf32, #tpu.memory_space<vmem>>, vector<20x1xf32>
    %cst_106 = arith.constant dense<0.000000e+00> : vector<16x1xf32>
    %670 = tpu.matmul %668, %669, %cst_106 {dimension_numbers = #tpu.dot_dimension_numbers<[1], [0], [0], [1], [0, 0, 1, 1], [], []>} : vector<16x20xf32>, vector<20x1xf32>, vector<16x1xf32> -> vector<16x1xf32>
    %c248 = arith.constant 248 : index
    %c0_107 = arith.constant 0 : index
    %671 = vector.load %arg1[%c248, %c0_107] : memref<256x128xf32, #tpu.memory_space<vmem>>, vector<1x1xf32>
    %672 = vector.broadcast %671 : vector<1x1xf32> to vector<16x1xf32>
    %673 = arith.addf %670, %672 : vector<16x1xf32>
    %c0_108 = arith.constant 0 : index
    %c0_109 = arith.constant 0 : index
    %674 = vector.load %arg2[%c0_108, %c0_109] : memref<16x1xf32, #tpu.memory_space<vmem>>, vector<16x1xf32>
    tpu.vector_store %arg2[%c0_108, %c0_109], %673 {strides = array<i32>} : memref<16x1xf32, #tpu.memory_space<vmem>>, vector<16x1xf32>,
    return
  }
}

</mosaic_0001>

<bundles_post_ra>
// kernel: xlstm_forward.1
= control target key start
LH: loop header
LB: loop body
LE: loop exit
PB: predicated region body
PF: predicated region fallthrough
CT: control target
= control target key end

     0   :  { %7 = vsyncpa [#allocation3], 0  ;;  %s2259_s9 = smov [#allocation2]   ;;  %s2705_s0 = inlined_call_operand.vmem [shape: f32[16,6], index: 0, kind: input, shape index: {}]   ;;  %s2706_s1 = inlined_call_operand.hbm [shape: f32[256,128], index: 1, kind: input, shape index: {}]   ;;  %s2707_s2 = inlined_call_operand.vmem [shape: f32[16,1], index: 2, kind: output, shape index: {}]  }
   0x1   :  { %s15_s10 = sshll.u32 %s2259_s9, 4  ;;  %s2235_s13 = scalar_lea.hbm %s2706_s1, 4096  ;;  %s16_s10 = int_to_ptr.vmem [resolvable:$true] %s15_s10 }
   0x2   :  { %p2236_p0 = scmp.ne.s32.totalorder %s2706_s1, %s2235_s13  ;;  %p2239_p1 = scmp.lt.u32.totalorder %s2235_s13, %s2706_s1 }
   0x4   :  { %p2241_p2 = pnand %p2239_p1, %p2236_p0 }
   0x6   :  { %2244 = shalt.err (!%p2241_p2)
}
   0x7   :  { %s2245_s18 = scalar_lea.vmem %s16_s10, 4096  ;;  %p2250_p4 = scmp.lt.s32.totalorder %s16_s10, %s16_s10 }
   0x8   :  { %p2246_p3 = scmp.ne.s32.totalorder %s16_s10, %s2245_s18  ;;  %p2251_p5 = scmp.lt.s32.totalorder %s2245_s18, %s2245_s18 }
   0xa   :  { %p2252_p6 = por %p2251_p5, %p2250_p4 }
   0xc   :  { %p2253_p7 = pnand %p2252_p6, %p2246_p3 }
   0xe   :  { %2256 = shalt.err (!%p2253_p7)
}
   0xf   :  { %s2260_s19 = smov 128   ;;  %s2261_s20 = smov 8  }
  0x10   :  { %21 = dma.hbm_to_vmem [thread:$0]  %s2706_s1, 4096, %s16_s10, [#allocation3], %s2260_s19, %s2260_s19, %s2261_s20  }
  0x11   :  { %2257 = dma.done.wait [#allocation3], 4096  }
  0x12   :  { %2258 = vsyncadd [#allocation3], 4294963200  ;;  %vm40_vm0 = vcmask 1045504   ;;  %vm33_vm1 = vcmask 48128   ;;  %v27_v0 = vld [vmem:[#allocation2] sm:$0x3f]  ;;  %v155_v27 = vlaneseq }
  0x13   :  { %v25_v1 = vld [vmem:[%s2705_s0] sm:$0xff]  ;;  %v26_v2 = vld [vmem:[%s2705_s0 + $0x8] sm:$0xff]  ;;  %1938 = vmatprep.subr.msk.mxu0 %vm40_vm0, %v27_v0  ;;  %v1860_v3 = vld [vmem:[#allocation2 + $0xb0] ss:$0 sm:$0xff]  ;;  %vm120_vm2 = vcmask 31744   ;;  %s2262_s0 = smov 4  }
  0x14   :  { %1940 = vmatprep.mubr.msk.f32.mxu0 %vm33_vm1, %v25_v1  ;;  %1939 = vmatpush3.msk.msra.mxu0 %vm40_vm0, %v27_v0  ;;  %v246_v26 = vld [vmem:[#allocation2 + $0x10] sm:$0xff]  ;;  %v2321_v28 = vshrl.u32 %v155_v27, 7  ;;  %v1864_v30 = vld [vmem:[#allocation2 + $0xb8] ss:$0 sm:$0xff]  ;;  %v154_v34 = vld [vmem:[#allocation2 + $0x8] sm:$0xf] }
  0x15   :  { %1941 = vmatmul.mubr.msk.f32.vlgmr.msra.gmra.mrb[0].mxu0 %vm33_vm1, %v26_v2  ;;  %1943 = vmatprep.subr.mxu1 %v246_v26  ;;  %vm247_vm9 = vcmask 64512   ;;  %s2263_s1 = smov 124   ;;  %s2264_s27 = smov 120   ;;  %vm1110_vm10 = vcmask 1041408   ;;  %vm1112_vm11 = vcmask 1043456   ;;  %vm1126_vm12 = vcmask 15360  }
  0x16   :  { %1944 = vmatpush3.msra.mxu1 %v246_v26  ;;  %v160_v32 = vsub.s32 3, %v2321_v28  ;;  %v175_v35 = vsub.s32 2, %v2321_v28  ;;  %vm166_vm3 = vcmp.lt.s32.totalorder %v2321_v28, 2  ;;  %v192_v39 = vsub.s32 1, %v2321_v28  ;;  %s2269_s28 = smov 12   ;;  %s2270_s29 = smov 116  }
  0x17   :  { %v209_v40 = vsub.s32 0, %v2321_v28  ;;  %vm169_vm4 = vcmp.ge.s32.totalorder %v2321_v28, 2  ;;  %vm183_vm5 = vcmp.lt.s32.totalorder %v2321_v28, 4  ;;  %vm186_vm6 = vcmp.ge.s32.totalorder %v2321_v28, 4  ;;  %s2271_s30 = smov 114  }
  0x18   :  { %v161_v38 = vrot.slane %v154_v34, %v160_v32  ;;  %v176_v42 = vrot.slane %v154_v34, %v175_v35  ;;  %vm200_vm7 = vcmp.lt.s32.totalorder %v2321_v28, 6  ;;  %v193_v49 = vrot.slane %v154_v34, %v192_v39 }
  0x19   :  { %vm203_vm8 = vcmp.ge.s32.totalorder %v2321_v28, 6  ;;  %v210_v50 = vrot.slane %v154_v34, %v209_v40  ;;  %vm1454_vm13 = vcmask 523264   ;;  %vm2272_vm14 = vmmov 1  }
  0x1a   :  { %vm2023_vm15 = vmpackc.low %vm40_vm0, %vm2272_vm14  ;;  %vm1672_vm1 = vcmask 244736  }
  0xe8   :  { %v1942_v4 = vpop.f32.mrb[0].mxu0 }
  0xe9   :  { %v110_v5 = vpop.f32.mrb[1].mxu0  ;;  %v2311_v7 = vadd.f32 %v1942_v4, %v1860_v3 }
  0xea   :  { %v2309_v6 = vadd.f32 %v1860_v3, %v110_v5 }
  0xeb   :  { %v124_v9 = vsel %vm120_vm2, %v2311_v7, 0.0 }
  0xec   :  { %v121_v8 = vsel %vm120_vm2, %v2309_v6, 0.0 }
  0xed   :  { %122 = vadd.xlane.f32.xlu0 %v121_v8 }
  0xf1   :  { %125 = vadd.xlane.f32.xlu0 %v124_v9 }
 0x17a   :  { %v123_v10 = vpop.xlane.xlu0 %122 }
 0x17b   :  { %v128_v11 = vmul.f32 0.25, %v123_v10 }
 0x17d   :  { %v130_v12 = vsub.f32 %v2309_v6, %v128_v11 }
 0x17e   :  { %v126_v13 = vpop.xlane.xlu0 %125 }
 0x17f   :  { %v129_v14 = vmul.f32 0.25, %v126_v13  ;;  %v132_v15 = vmul.f32 %v130_v12, %v130_v12 }
 0x181   :  { %v131_v16 = vsub.f32 %v2311_v7, %v129_v14  ;;  %v134_v17 = vsel %vm120_vm2, %v132_v15, 0.0 }
 0x182   :  { %135 = vadd.xlane.f32.xlu1 %v134_v17 }
 0x183   :  { %v133_v18 = vmul.f32 %v131_v16, %v131_v16 }
 0x185   :  { %v137_v19 = vsel %vm120_vm2, %v133_v18, 0.0 }
 0x186   :  { %138 = vadd.xlane.f32.xlu1 %v137_v19 }
 0x20f   :  { %v136_v20 = vpop.xlane.xlu1 %135 }
 0x210   :  { %v140_v21 = vmul.f32 0.25, %v136_v20 }
 0x212   :  { %v142_v22 = vadd.f32 1e-05, %v140_v21 }
 0x213   :  { %v139_v23 = vpop.xlane.xlu1 %138 }
 0x214   :  { %2074 = vrsqrt.f32 %v142_v22  ;;  %v141_v24 = vmul.f32 0.25, %v139_v23 }
 0x216   :  { %v143_v25 = vadd.f32 1e-05, %v141_v24 }
 0x218   :  { %2076 = vrsqrt.f32 %v143_v25 }
 0x21e   :  { %v2075_v29 = vpop.eup %2074 }
 0x21f   :  { %v146_v31 = vmul.f32 %v2075_v29, %v130_v12  ;;  %v1865_v12 = vld [vmem:[#allocation2 + $0xc0] ss:$0 sm:$0xff] }
 0x221   :  { %v152_v33 = vmul.f32 %v1864_v30, %v146_v31 }
 0x222   :  { %v2077_v36 = vpop.eup %2076 }
 0x223   :  { %v147_v37 = vmul.f32 %v2077_v36, %v131_v16  ;;  %238 = vrot.lane.b32.xlu0 %v152_v33, %s2262_s0  ;;  %v164_v43 = vrot.slane %v152_v33, 6  ;;  %v181_v44 = vrot.slane %v152_v33, 4  ;;  %v198_v47 = vrot.slane %v152_v33, 2 }
 0x224   :  { %v162_v59 = vmul.f32 %v161_v38, %v152_v33 }
 0x225   :  { %v153_v41 = vmul.f32 %v1864_v30, %v147_v37  ;;  %v2359_v30 = vld [vmem:[#allocation2 + $0xc8] ss:$0 sm:$0xff] }
 0x227   :  { %240 = vrot.lane.b32.xlu1 %v153_v41, %s2262_s0  ;;  %v165_v45 = vrot.slane %v153_v41, 6  ;;  %v182_v46 = vrot.slane %v153_v41, 4  ;;  %v199_v48 = vrot.slane %v153_v41, 2  ;;  %v163_v57 = vmul.f32 %v161_v38, %v153_v41 }
 0x229   :  { %v168_v51 = vsel %vm166_vm3, %v165_v45, %v164_v43  ;;  %v185_v52 = vsel %vm183_vm5, %v182_v46, %v181_v44  ;;  %v202_v53 = vsel %vm200_vm7, %v199_v48, %v198_v47  ;;  %v167_v54 = vsel %vm166_vm3, %v164_v43, %v165_v45 }
 0x22a   :  { %v171_v55 = vsel %vm169_vm4, %v168_v51, 0.0  ;;  %v188_v56 = vsel %vm186_vm6, %v185_v52, 0.0  ;;  %v178_v58 = vmul.f32 %v176_v42, %v167_v54  ;;  %v184_v61 = vsel %vm183_vm5, %v181_v44, %v182_v46 }
 0x22b   :  { %v177_v60 = vmul.f32 %v176_v42, %v171_v55  ;;  %v205_v62 = vsel %vm203_vm8, %v202_v53, 0.0  ;;  %v195_v0 = vmul.f32 %v193_v49, %v184_v61  ;;  %v201_v1 = vsel %vm200_vm7, %v198_v47, %v199_v48 }
 0x22c   :  { %v180_v63 = vadd.f32 %v178_v58, %v163_v57  ;;  %v194_v3 = vmul.f32 %v193_v49, %v188_v56  ;;  %v212_v5 = vmul.f32 %v210_v50, %v201_v1  ;;  %v211_v9 = vmul.f32 %v210_v50, %v205_v62 }
 0x22d   :  { %v179_v2 = vadd.f32 %v177_v60, %v162_v59  ;;  %v2266_v1 = vmov 12  }
 0x22e   :  { %v197_v4 = vadd.f32 %v195_v0, %v180_v63  ;;  %v2265_v0 = vmov 13   ;;  %2046 = vset.pattern.permute.xlu1 %v2266_v1 }
 0x22f   :  { %v196_v8 = vadd.f32 %v194_v3, %v179_v2  ;;  %2047 = vset.pattern.permute.xlu0 %v2265_v0 }
 0x230   :  { %v214_v10 = vadd.f32 %v212_v5, %v197_v4 }
 0x231   :  { %v213_v11 = vadd.f32 %v211_v9, %v196_v8 }
 0x232   :  { %v221_v15 = vadd.f32 %v1865_v12, %v214_v10 }
 0x233   :  { %v220_v13 = vadd.f32 %v1865_v12, %v213_v11 }
 0x234   :  { %v1867_v16 = vmul.f32 -1.442695, %v221_v15 }
 0x235   :  { %v1866_v14 = vmul.f32 -1.442695, %v220_v13 }
 0x237   :  { %2078 = vpow2.f32 %v1866_v14 }
 0x238   :  { %2080 = vpow2.f32 %v1867_v16  ;;  %v2267_v16 = vmov 14  }
 0x241   :  { %v2079_v17 = vpop.eup %2078 }
 0x242   :  { %v228_v18 = vadd.f32 1.0, %v2079_v17  ;;  %v2081_v19 = vpop.eup %2080  ;;  %v2268_v17 = vmov 15  }
 0x243   :  { %v229_v20 = vadd.f32 1.0, %v2081_v19 }
 0x244   :  { %2082 = vrcp.f32 %v228_v18  ;;  %v329_v18 = vld [vmem:[#allocation2 + $0x18] sm:$0xf] }
 0x245   :  { %2084 = vrcp.f32 %v229_v20  ;;  %v2394_v19 = vrot.slane %v329_v18, %v209_v40  ;;  %v2409_v40 = vrot.slane %v329_v18, %v160_v32 }
 0x24e   :  { %v2083_v21 = vpop.eup %2082 }
 0x24f   :  { %v234_v22 = vmul.f32 %v2083_v21, %v220_v13  ;;  %v2085_v23 = vpop.eup %2084  ;;  %v2398_v21 = vrot.slane %v329_v18, %v192_v39 }
 0x250   :  { %v235_v26 = vmul.f32 %v2085_v23, %v221_v15 }
 0x295   :  { %v239_v24 = vpop.permute.xlu0 %238 }
 0x296   :  { %v244_v25 = vsel %vm120_vm2, %v234_v22, %v239_v24  ;;  %v2403_v24 = vrot.slane %v329_v18, %v175_v35 }
 0x297   :  { %1945 = vmatprep.mubr.msk.f32.mxu1 %vm247_vm9, %v244_v25 }
 0x299   :  { %v241_v27 = vpop.permute.xlu1 %240 }
 0x29a   :  { %v245_v29 = vsel %vm120_vm2, %v235_v26, %v241_v27 }
 0x29b   :  { %1946 = vmatmul.mubr.msk.f32.vlgmr.msra.gmra.mrb[0].mxu1 %vm247_vm9, %v245_v29 }
 0x36e   :  { %v2361_v31 = vpop.f32.mrb[0].mxu1 }
 0x36f   :  { %v2363_v33 = vpop.f32.mrb[1].mxu1 }
 0x370   :  { %v351_v34 = vadd.f32 %v2359_v30, %v2363_v33 }
 0x372   :  { %v353_v36 = vand.u32 2147483647, %v351_v34  ;;  %v352_v44 = vmin.f32 %v351_v34, 0.0  ;;  %v1871_v8 = vmul.f32 -1.442695, %v351_v34 }
 0x374   :  { %v354_v37 = vsub.f32 0.0, %v353_v36 }
 0x376   :  { %v355_v38 = vmul.f32 1.442695, %v354_v37 }
 0x378   :  { %2086 = vpow2.f32 %v355_v38 }
 0x382   :  { %v2087_v41 = vpop.eup %2086 }
 0x383   :  { %v357_v42 = vadd.f32 1.0, %v2087_v41 }
 0x385   :  { %2088 = vlog2.f32 %v357_v42 }
 0x386   :  { %2090 = vtanh.f32 %v351_v34 }
 0x38f   :  { %v2089_v43 = vpop.eup %2088 }
 0x390   :  { %v359_v45 = vmul.f32 0.6931472, %v2089_v43  ;;  %v2091_v47 = vpop.eup %2090 }
 0x392   :  { %v360_v46 = vsub.f32 %v352_v44, %v359_v45 }
 0x394   :  { %363 = vrot.lane.b32.xlu1 %v360_v46, %s2263_s1 }
 0x398   :  { %386 = vrot.lane.b32.xlu1 %v2091_v47, %s2264_s27 }
 0x406   :  { %v364_v48 = vpop.permute.xlu1 %363 }
 0x407   :  { %v2369_v49 = vmax.f32 %v351_v34, %v364_v48 }
 0x409   :  { %v367_v50 = vsub.f32 %v351_v34, %v2369_v49  ;;  %371 = vrot.lane.b32.xlu0 %v2369_v49, %s2262_s0 }
 0x40a   :  { %v387_v53 = vpop.permute.xlu1 %386 }
 0x40b   :  { %v368_v51 = vmul.f32 1.442695, %v367_v50 }
 0x40d   :  { %2092 = vpow2.f32 %v368_v51 }
 0x417   :  { %v2093_v52 = vpop.eup %2092 }
 0x418   :  { %v389_v54 = vmul.f32 %v2093_v52, %v387_v53  ;;  %396 = vrot.lane.b32.xlu1 %v2093_v52, %s2262_s0 }
 0x41a   :  { %391 = vrot.lane.b32.xlu0 %v389_v54, %s2262_s0 }
 0x47b   :  { %v372_v55 = vpop.permute.xlu0 %371 }
 0x47c   :  { %v374_v56 = vsub.f32 %v360_v46, %v372_v55 }
 0x47e   :  { %v375_v57 = vmul.f32 1.442695, %v374_v56 }
 0x480   :  { %2094 = vpow2.f32 %v375_v57 }
 0x48a   :  { %v2095_v58 = vpop.eup %2094  ;;  %v397_v60 = vpop.permute.xlu1 %396 }
 0x48b   :  { %v383_v59 = vmul.f32 0.0, %v2095_v58 }
 0x48c   :  { %v392_v61 = vpop.permute.xlu0 %391 }
 0x48d   :  { %v399_v62 = vadd.f32 %v397_v60, %v383_v59  ;;  %v394_v63 = vadd.f32 %v392_v61, %v383_v59 }
 0x48f   :  { %2096 = vrcp.f32 %v399_v62  ;;  %405 = vrot.lane.b32.xlu1 %v394_v63, %s2261_s20 }
 0x490   :  { %2098 = vpow2.f32 %v1871_v8 }
 0x499   :  { %v2097_v2 = vpop.eup %2096 }
 0x49a   :  { %v401_v3 = vmul.f32 %v2097_v2, %v399_v62  ;;  %v2099_v9 = vpop.eup %2098 }
 0x49b   :  { %v380_v10 = vadd.f32 1.0, %v2099_v9 }
 0x49c   :  { %v402_v4 = vsub.f32 2.0, %v401_v3 }
 0x49d   :  { %2100 = vrcp.f32 %v380_v10 }
 0x49e   :  { %v403_v5 = vmul.f32 %v2097_v2, %v402_v4 }
 0x4a0   :  { %410 = vrot.lane.b32.xlu0 %v403_v5, %s2261_s20 }
 0x4a7   :  { %v2101_v12 = vpop.eup %2100 }
 0x501   :  { %v406_v11 = vpop.permute.xlu1 %405 }
 0x502   :  { %v408_v13 = vmul.f32 %v2101_v12, %v406_v11 }
 0x512   :  { %v411_v14 = vpop.permute.xlu0 %410 }
 0x513   :  { %v2380_v15 = vmul.f32 %v411_v14, %v408_v13 }
 0x515   :  { %422 = vperm.xlu0 %2047, %v2380_v15   ;;  %416 = vperm.xlu1 %2046, %v2380_v15  }
 0x519   :  { %2048 = vset.pattern.permute.xlu1 %v2267_v16  ;;  %2050 = vset.pattern.permute.xlu0 %v2266_v1 }
 0x51a   :  { %428 = vperm.xlu1 %2048, %v2380_v15  }
 0x51e   :  { %2049 = vset.pattern.permute.xlu1 %v2268_v17 }
 0x51f   :  { %434 = vperm.xlu1 %2049, %v2380_v15  }
 0x523   :  { %492 = vrot.lane.b32.xlu1 %v399_v62, %s2263_s1 }
 0x524   :  { %2051 = vset.pattern.permute.xlu1 %v2265_v0 }
 0x527   :  { %477 = vrot.lane.b32.xlu1 %v394_v63, %s2263_s1 }
 0x594   :  { %v417_v20 = vpop.permute.xlu1 %416  ;;  %v423_v23 = vpop.permute.xlu0 %422 }
 0x595   :  { %v419_v22 = vmul.f32 %v417_v20, %v2394_v19  ;;  %v425_v26 = vmul.f32 %v423_v23, %v2398_v21 }
 0x597   :  { %v420_v25 = vadd.f32 %v2359_v30, %v419_v22 }
 0x599   :  { %v429_v27 = vpop.permute.xlu1 %428  ;;  %v426_v29 = vadd.f32 %v425_v26, %v420_v25 }
 0x59a   :  { %v431_v39 = vmul.f32 %v429_v27, %v2403_v24 }
 0x59c   :  { %v432_v36 = vadd.f32 %v431_v39, %v426_v29 }
 0x59e   :  { %v435_v34 = vpop.permute.xlu1 %434 }
 0x59f   :  { %v437_v37 = vmul.f32 %v435_v34, %v2409_v40 }
 0x5a1   :  { %v438_v38 = vadd.f32 %v437_v37, %v432_v36 }
 0x5a2   :  { %v493_v61 = vpop.permute.xlu1 %492 }
 0x5a3   :  { %v440_v41 = vrot.slane %v438_v38, 6 }
 0x5a5   :  { %v442_v35 = vadd.f32 %v440_v41, %v2363_v33 }
 0x5a6   :  { %v478_v4 = vpop.permute.xlu1 %477 }
 0x5a7   :  { %v444_v42 = vand.u32 2147483647, %v442_v35  ;;  %v443_v32 = vmin.f32 %v442_v35, 0.0  ;;  %v1872_v23 = vmul.f32 -1.442695, %v442_v35 }
 0x5a9   :  { %v445_v43 = vsub.f32 0.0, %v444_v42 }
 0x5ab   :  { %v446_v44 = vmul.f32 1.442695, %v445_v43 }
 0x5ad   :  { %2102 = vpow2.f32 %v446_v44 }
 0x5b7   :  { %v2103_v45 = vpop.eup %2102 }
 0x5b8   :  { %v448_v46 = vadd.f32 1.0, %v2103_v45 }
 0x5ba   :  { %2104 = vlog2.f32 %v448_v46 }
 0x5bb   :  { %2106 = vtanh.f32 %v442_v35 }
 0x5c4   :  { %v2105_v28 = vpop.eup %2104 }
 0x5c5   :  { %v450_v47 = vmul.f32 0.6931472, %v2105_v28  ;;  %v2107_v51 = vpop.eup %2106 }
 0x5c7   :  { %v451_v48 = vsub.f32 %v443_v32, %v450_v47 }
 0x5c9   :  { %v453_v50 = vrot.slane %v451_v48, 2 }
 0x5cb   :  { %454 = vrot.lane.b32.xlu0 %v453_v50, %s2263_s1 }
 0x5cf   :  { %483 = vrot.lane.b32.xlu0 %v2107_v51, %s2264_s27 }
 0x63d   :  { %v455_v52 = vpop.permute.xlu0 %454 }
 0x63e   :  { %v457_v53 = vadd.f32 %v455_v52, %v2369_v49 }
 0x640   :  { %v459_v54 = vrot.slane %v457_v53, 6 }
 0x641   :  { %v484_v63 = vpop.permute.xlu0 %483 }
 0x642   :  { %v2417_v55 = vmax.f32 %v442_v35, %v459_v54 }
 0x644   :  { %v462_v56 = vsub.f32 %v442_v35, %v2417_v55  ;;  %v466_v57 = vrot.slane %v2417_v55, 2 }
 0x646   :  { %v463_v58 = vmul.f32 1.442695, %v462_v56  ;;  %v468_v59 = vsub.f32 %v457_v53, %v466_v57 }
 0x648   :  { %2108 = vpow2.f32 %v463_v58  ;;  %v469_v60 = vmul.f32 1.442695, %v468_v59 }
 0x64a   :  { %2110 = vpow2.f32 %v469_v60 }
 0x652   :  { %v2109_v62 = vpop.eup %2108 }
 0x653   :  { %v486_v2 = vmul.f32 %v2109_v62, %v484_v63  ;;  %v497_v9 = vrot.slane %v2109_v62, 2 }
 0x654   :  { %v2111_v3 = vpop.eup %2110 }
 0x655   :  { %v480_v5 = vmul.f32 %v2111_v3, %v478_v4  ;;  %v488_v49 = vrot.slane %v486_v2, 2  ;;  %v495_v8 = vmul.f32 %v2111_v3, %v493_v61 }
 0x657   :  { %v2421_v10 = vadd.f32 %v488_v49, %v480_v5  ;;  %v2423_v11 = vadd.f32 %v497_v9, %v495_v8 }
 0x659   :  { %v505_v12 = vrot.slane %v2421_v10, 6  ;;  %2112 = vrcp.f32 %v2423_v11 }
 0x65a   :  { %2114 = vpow2.f32 %v1872_v23 }
 0x65b   :  { %506 = vrot.lane.b32.xlu0 %v505_v12, %s2269_s28 }
 0x663   :  { %v2113_v13 = vpop.eup %2112 }
 0x664   :  { %v501_v14 = vmul.f32 %v2113_v13, %v2423_v11  ;;  %v2115_v25 = vpop.eup %2114 }
 0x665   :  { %v474_v26 = vadd.f32 1.0, %v2115_v25 }
 0x666   :  { %v502_v18 = vsub.f32 2.0, %v501_v14 }
 0x667   :  { %2116 = vrcp.f32 %v474_v26 }
 0x668   :  { %v503_v20 = vmul.f32 %v2113_v13, %v502_v18 }
 0x66a   :  { %v511_v22 = vrot.slane %v503_v20, 6 }
 0x66c   :  { %512 = vrot.lane.b32.xlu1 %v511_v22, %s2269_s28  ;;  %v592_v22 = vrot.slane %v2423_v11, 6 }
 0x671   :  { %v2117_v29 = vpop.eup %2116 }
 0x6cd   :  { %v507_v27 = vpop.permute.xlu0 %506 }
 0x6ce   :  { %v509_v39 = vmul.f32 %v2117_v29, %v507_v27 }
 0x6de   :  { %v513_v34 = vpop.permute.xlu1 %512 }
 0x6df   :  { %v2432_v36 = vmul.f32 %v513_v34, %v509_v39 }
 0x6e1   :  { %524 = vperm.xlu1 %2051, %v2432_v36   ;;  %518 = vperm.xlu0 %2050, %v2432_v36  }
 0x6e5   :  { %2052 = vset.pattern.permute.xlu1 %v2267_v16  ;;  %2053 = vset.pattern.permute.xlu0 %v2268_v17 }
 0x6e6   :  { %530 = vperm.xlu1 %2052, %v2432_v36   ;;  %536 = vperm.xlu0 %2053, %v2432_v36  }
 0x6ea   :  { %2055 = vset.pattern.permute.xlu1 %v2265_v0  ;;  %2054 = vset.pattern.permute.xlu0 %v2266_v1 }
 0x760   :  { %v525_v37 = vpop.permute.xlu1 %524  ;;  %v519_v38 = vpop.permute.xlu0 %518 }
 0x761   :  { %v521_v41 = vmul.f32 %v519_v38, %v2394_v19  ;;  %v527_v35 = vmul.f32 %v525_v37, %v2398_v21 }
 0x763   :  { %v522_v42 = vadd.f32 %v2359_v30, %v521_v41 }
 0x765   :  { %v531_v43 = vpop.permute.xlu1 %530  ;;  %v528_v44 = vadd.f32 %v527_v35, %v522_v42  ;;  %v537_v45 = vpop.permute.xlu0 %536 }
 0x766   :  { %v533_v46 = vmul.f32 %v531_v43, %v2403_v24  ;;  %v539_v32 = vmul.f32 %v537_v45, %v2409_v40 }
 0x768   :  { %v534_v28 = vadd.f32 %v533_v46, %v528_v44 }
 0x76a   :  { %v540_v47 = vadd.f32 %v539_v32, %v534_v28  ;;  %v1111_v32 = vsel %vm1110_vm10, %v2380_v15, %v2432_v36 }
 0x76c   :  { %v542_v48 = vrot.slane %v540_v47, 6 }
 0x76e   :  { %v544_v50 = vadd.f32 %v542_v48, %v2363_v33 }
 0x770   :  { %v546_v51 = vand.u32 2147483647, %v544_v50  ;;  %v545_v58 = vmin.f32 %v544_v50, 0.0  ;;  %v1873_v41 = vmul.f32 -1.442695, %v544_v50 }
 0x772   :  { %v547_v52 = vsub.f32 0.0, %v546_v51 }
 0x774   :  { %v548_v53 = vmul.f32 1.442695, %v547_v52 }
 0x776   :  { %2118 = vpow2.f32 %v548_v53 }
 0x780   :  { %v2119_v54 = vpop.eup %2118 }
 0x781   :  { %v550_v56 = vadd.f32 1.0, %v2119_v54 }
 0x783   :  { %2120 = vlog2.f32 %v550_v56 }
 0x784   :  { %2122 = vtanh.f32 %v544_v50 }
 0x78d   :  { %v2121_v57 = vpop.eup %2120 }
 0x78e   :  { %v552_v59 = vmul.f32 0.6931472, %v2121_v57  ;;  %v2123_v62 = vpop.eup %2122 }
 0x790   :  { %v553_v60 = vsub.f32 %v545_v58, %v552_v59 }
 0x792   :  { %v555_v61 = vrot.slane %v553_v60, 2 }
 0x794   :  { %556 = vrot.lane.b32.xlu1 %v555_v61, %s2263_s1 }
 0x798   :  { %583 = vrot.lane.b32.xlu1 %v2123_v62, %s2264_s27 }
 0x806   :  { %v557_v63 = vpop.permute.xlu1 %556 }
 0x807   :  { %v559_v2 = vadd.f32 %v557_v63, %v2417_v55 }
 0x809   :  { %v561_v3 = vrot.slane %v559_v2, 6 }
 0x80a   :  { %v584_v18 = vpop.permute.xlu1 %583 }
 0x80b   :  { %v2451_v4 = vmax.f32 %v544_v50, %v561_v3 }
 0x80d   :  { %v564_v5 = vsub.f32 %v544_v50, %v2451_v4  ;;  %v568_v49 = vrot.slane %v2451_v4, 2 }
 0x80f   :  { %v565_v8 = vmul.f32 1.442695, %v564_v5  ;;  %v570_v9 = vsub.f32 %v559_v2, %v568_v49 }
 0x811   :  { %2124 = vpow2.f32 %v565_v8  ;;  %v571_v13 = vmul.f32 1.442695, %v570_v9 }
 0x813   :  { %2126 = vpow2.f32 %v571_v13 }
 0x81b   :  { %v2125_v14 = vpop.eup %2124 }
 0x81c   :  { %v586_v20 = vmul.f32 %v2125_v14, %v584_v18  ;;  %v596_v27 = vrot.slane %v2125_v14, 2 }
 0x81d   :  { %v2127_v23 = vpop.eup %2126 }
 0x81e   :  { %v580_v55 = vmul.f32 %v2127_v23, %v505_v12  ;;  %v588_v25 = vrot.slane %v586_v20, 2  ;;  %v594_v26 = vmul.f32 %v2127_v23, %v592_v22 }
 0x820   :  { %v2458_v29 = vadd.f32 %v588_v25, %v580_v55  ;;  %v2460_v39 = vadd.f32 %v596_v27, %v594_v26 }
 0x822   :  { %v604_v34 = vrot.slane %v2458_v29, 6  ;;  %2128 = vrcp.f32 %v2460_v39 }
 0x823   :  { %2130 = vpow2.f32 %v1873_v41 }
 0x824   :  { %605 = vrot.lane.b32.xlu0 %v604_v34, %s2269_s28 }
 0x82c   :  { %v2129_v11 = vpop.eup %2128 }
 0x82d   :  { %v600_v37 = vmul.f32 %v2129_v11, %v2460_v39  ;;  %v2131_v35 = vpop.eup %2130 }
 0x82e   :  { %v576_v42 = vadd.f32 1.0, %v2131_v35 }
 0x82f   :  { %v601_v10 = vsub.f32 2.0, %v600_v37 }
 0x830   :  { %2132 = vrcp.f32 %v576_v42 }
 0x831   :  { %v602_v12 = vmul.f32 %v2129_v11, %v601_v10 }
 0x833   :  { %v610_v38 = vrot.slane %v602_v12, 6 }
 0x835   :  { %611 = vrot.lane.b32.xlu1 %v610_v38, %s2269_s28  ;;  %v691_v38 = vrot.slane %v2460_v39, 6 }
 0x83a   :  { %v2133_v44 = vpop.eup %2132 }
 0x896   :  { %v606_v43 = vpop.permute.xlu0 %605 }
 0x897   :  { %v608_v45 = vmul.f32 %v2133_v44, %v606_v43 }
 0x8a7   :  { %v612_v46 = vpop.permute.xlu1 %611 }
 0x8a8   :  { %v614_v28 = vmul.f32 %v612_v46, %v608_v45 }
 0x8aa   :  { %623 = vperm.xlu1 %2055, %v614_v28   ;;  %617 = vperm.xlu0 %2054, %v614_v28   ;;  %v2473_v47 = vsel %vm1112_vm11, %v1111_v32, %v614_v28 }
 0x8ae   :  { %2056 = vset.pattern.permute.xlu1 %v2267_v16  ;;  %2057 = vset.pattern.permute.xlu0 %v2268_v17 }
 0x8af   :  { %629 = vperm.xlu1 %2056, %v614_v28   ;;  %635 = vperm.xlu0 %2057, %v614_v28  }
 0x8b3   :  { %2059 = vset.pattern.permute.xlu1 %v2265_v0  ;;  %2058 = vset.pattern.permute.xlu0 %v2266_v1 }
 0x929   :  { %v624_v48 = vpop.permute.xlu1 %623  ;;  %v618_v50 = vpop.permute.xlu0 %617 }
 0x92a   :  { %v620_v51 = vmul.f32 %v618_v50, %v2394_v19  ;;  %v626_v15 = vmul.f32 %v624_v48, %v2398_v21 }
 0x92c   :  { %v621_v36 = vadd.f32 %v2359_v30, %v620_v51 }
 0x92e   :  { %v630_v52 = vpop.permute.xlu1 %629  ;;  %v627_v53 = vadd.f32 %v626_v15, %v621_v36  ;;  %v636_v54 = vpop.permute.xlu0 %635 }
 0x92f   :  { %v632_v56 = vmul.f32 %v630_v52, %v2403_v24  ;;  %v638_v58 = vmul.f32 %v636_v54, %v2409_v40 }
 0x931   :  { %v633_v57 = vadd.f32 %v632_v56, %v627_v53 }
 0x933   :  { %v639_v59 = vadd.f32 %v638_v58, %v633_v57 }
 0x935   :  { %v641_v60 = vrot.slane %v639_v59, 6 }
 0x937   :  { %v643_v61 = vadd.f32 %v641_v60, %v2363_v33 }
 0x939   :  { %v645_v62 = vand.u32 2147483647, %v643_v61  ;;  %v644_v8 = vmin.f32 %v643_v61, 0.0  ;;  %v1874_v48 = vmul.f32 -1.442695, %v643_v61 }
 0x93b   :  { %v646_v63 = vsub.f32 0.0, %v645_v62 }
 0x93d   :  { %v647_v2 = vmul.f32 1.442695, %v646_v63 }
 0x93f   :  { %2134 = vpow2.f32 %v647_v2 }
 0x949   :  { %v2135_v3 = vpop.eup %2134 }
 0x94a   :  { %v649_v5 = vadd.f32 1.0, %v2135_v3 }
 0x94c   :  { %2136 = vlog2.f32 %v649_v5 }
 0x94d   :  { %2138 = vtanh.f32 %v643_v61 }
 0x956   :  { %v2137_v49 = vpop.eup %2136 }
 0x957   :  { %v651_v9 = vmul.f32 0.6931472, %v2137_v49  ;;  %v2139_v18 = vpop.eup %2138 }
 0x959   :  { %v652_v13 = vsub.f32 %v644_v8, %v651_v9 }
 0x95b   :  { %v654_v14 = vrot.slane %v652_v13, 2 }
 0x95d   :  { %655 = vrot.lane.b32.xlu1 %v654_v14, %s2263_s1 }
 0x961   :  { %682 = vrot.lane.b32.xlu1 %v2139_v18, %s2264_s27 }
 0x9cf   :  { %v656_v20 = vpop.permute.xlu1 %655 }
 0x9d0   :  { %v658_v33 = vadd.f32 %v656_v20, %v2451_v4 }
 0x9d2   :  { %v660_v22 = vrot.slane %v658_v33, 6 }
 0x9d3   :  { %v683_v10 = vpop.permute.xlu1 %682 }
 0x9d4   :  { %v2488_v23 = vmax.f32 %v643_v61, %v660_v22 }
 0x9d6   :  { %v663_v55 = vsub.f32 %v643_v61, %v2488_v23  ;;  %v667_v25 = vrot.slane %v2488_v23, 2 }
 0x9d8   :  { %v664_v26 = vmul.f32 1.442695, %v663_v55  ;;  %v669_v27 = vsub.f32 %v658_v33, %v667_v25 }
 0x9da   :  { %2140 = vpow2.f32 %v664_v26  ;;  %v670_v11 = vmul.f32 1.442695, %v669_v27 }
 0x9dc   :  { %2142 = vpow2.f32 %v670_v11 }
 0x9e4   :  { %v2141_v37 = vpop.eup %2140 }
 0x9e5   :  { %v685_v12 = vmul.f32 %v2141_v37, %v683_v10  ;;  %v695_v43 = vrot.slane %v2141_v37, 2 }
 0x9e6   :  { %v2143_v41 = vpop.eup %2142 }
 0x9e7   :  { %v679_v4 = vmul.f32 %v2143_v41, %v604_v34  ;;  %v687_v35 = vrot.slane %v685_v12, 2  ;;  %v693_v42 = vmul.f32 %v2143_v41, %v691_v38 }
 0x9e9   :  { %v2495_v44 = vadd.f32 %v687_v35, %v679_v4  ;;  %v2497_v45 = vadd.f32 %v695_v43, %v693_v42 }
 0x9eb   :  { %v703_v46 = vrot.slane %v2495_v44, 6  ;;  %2144 = vrcp.f32 %v2497_v45 }
 0x9ec   :  { %2146 = vpow2.f32 %v1874_v48 }
 0x9ed   :  { %704 = vrot.lane.b32.xlu0 %v703_v46, %s2269_s28 }
 0x9f5   :  { %v2145_v39 = vpop.eup %2144 }
 0x9f6   :  { %v699_v28 = vmul.f32 %v2145_v39, %v2497_v45  ;;  %v2147_v50 = vpop.eup %2146 }
 0x9f7   :  { %v675_v51 = vadd.f32 1.0, %v2147_v50 }
 0x9f8   :  { %v700_v29 = vsub.f32 2.0, %v699_v28 }
 0x9f9   :  { %2148 = vrcp.f32 %v675_v51 }
 0x9fa   :  { %v701_v34 = vmul.f32 %v2145_v39, %v700_v29 }
 0x9fc   :  { %v709_v32 = vrot.slane %v701_v34, 6  ;;  %v790_v34 = vrot.slane %v2497_v45, 6 }
 0x9fe   :  { %710 = vrot.lane.b32.xlu1 %v709_v32, %s2269_s28 }
 0xa03   :  { %v2149_v36 = vpop.eup %2148 }
 0xa5f   :  { %v705_v15 = vpop.permute.xlu0 %704 }
 0xa60   :  { %v707_v52 = vmul.f32 %v2149_v36, %v705_v15 }
 0xa70   :  { %v711_v53 = vpop.permute.xlu1 %710 }
 0xa71   :  { %v713_v54 = vmul.f32 %v711_v53, %v707_v52 }
 0xa73   :  { %722 = vperm.xlu1 %2059, %v713_v54   ;;  %716 = vperm.xlu0 %2058, %v713_v54   ;;  %v2508_v56 = vsel %vm40_vm0, %v2473_v47, %v713_v54 }
 0xa77   :  { %2060 = vset.pattern.permute.xlu1 %v2267_v16  ;;  %2061 = vset.pattern.permute.xlu0 %v2268_v17 }
 0xa78   :  { %728 = vperm.xlu1 %2060, %v713_v54   ;;  %734 = vperm.xlu0 %2061, %v713_v54  }
 0xa7c   :  { %2063 = vset.pattern.permute.xlu1 %v2265_v0  ;;  %2062 = vset.pattern.permute.xlu0 %v2266_v1 }
 0xaf2   :  { %v723_v57 = vpop.permute.xlu1 %722  ;;  %v717_v58 = vpop.permute.xlu0 %716 }
 0xaf3   :  { %v719_v59 = vmul.f32 %v717_v58, %v2394_v19  ;;  %v725_v60 = vmul.f32 %v723_v57, %v2398_v21 }
 0xaf5   :  { %v720_v61 = vadd.f32 %v2359_v30, %v719_v59 }
 0xaf7   :  { %v729_v47 = vpop.permute.xlu1 %728  ;;  %v726_v62 = vadd.f32 %v725_v60, %v720_v61  ;;  %v735_v63 = vpop.permute.xlu0 %734 }
 0xaf8   :  { %v731_v2 = vmul.f32 %v729_v47, %v2403_v24  ;;  %v737_v5 = vmul.f32 %v735_v63, %v2409_v40 }
 0xafa   :  { %v732_v3 = vadd.f32 %v731_v2, %v726_v62 }
 0xafc   :  { %v738_v49 = vadd.f32 %v737_v5, %v732_v3 }
 0xafe   :  { %v740_v8 = vrot.slane %v738_v49, 6 }
 0xb00   :  { %v742_v9 = vadd.f32 %v2361_v31, %v740_v8 }
 0xb02   :  { %v744_v13 = vand.u32 2147483647, %v742_v9  ;;  %v743_v55 = vmin.f32 %v742_v9, 0.0  ;;  %v1875_v57 = vmul.f32 -1.442695, %v742_v9 }
 0xb04   :  { %v745_v14 = vsub.f32 0.0, %v744_v13 }
 0xb06   :  { %v746_v18 = vmul.f32 1.442695, %v745_v14 }
 0xb08   :  { %2150 = vpow2.f32 %v746_v18 }
 0xb12   :  { %v2151_v20 = vpop.eup %2150 }
 0xb13   :  { %v748_v33 = vadd.f32 1.0, %v2151_v20 }
 0xb15   :  { %2152 = vlog2.f32 %v748_v33 }
 0xb16   :  { %2154 = vtanh.f32 %v742_v9 }
 0xb1f   :  { %v2153_v22 = vpop.eup %2152 }
 0xb20   :  { %v750_v25 = vmul.f32 0.6931472, %v2153_v22  ;;  %v2155_v11 = vpop.eup %2154 }
 0xb22   :  { %v751_v26 = vsub.f32 %v743_v55, %v750_v25 }
 0xb24   :  { %v753_v27 = vrot.slane %v751_v26, 2 }
 0xb26   :  { %754 = vrot.lane.b32.xlu1 %v753_v27, %s2263_s1 }
 0xb2a   :  { %781 = vrot.lane.b32.xlu1 %v2155_v11, %s2264_s27 }
 0xb98   :  { %v755_v37 = vpop.permute.xlu1 %754 }
 0xb99   :  { %v757_v10 = vadd.f32 %v755_v37, %v2488_v23 }
 0xb9b   :  { %v759_v12 = vrot.slane %v757_v10, 6 }
 0xb9c   :  { %v782_v28 = vpop.permute.xlu1 %781 }
 0xb9d   :  { %v2523_v38 = vmax.f32 %v742_v9, %v759_v12 }
 0xb9f   :  { %v762_v41 = vsub.f32 %v742_v9, %v2523_v38  ;;  %v766_v4 = vrot.slane %v2523_v38, 2 }
 0xba1   :  { %v763_v35 = vmul.f32 1.442695, %v762_v41  ;;  %v768_v42 = vsub.f32 %v757_v10, %v766_v4 }
 0xba3   :  { %2156 = vpow2.f32 %v763_v35  ;;  %v769_v43 = vmul.f32 1.442695, %v768_v42 }
 0xba5   :  { %2158 = vpow2.f32 %v769_v43 }
 0xbad   :  { %v2157_v39 = vpop.eup %2156 }
 0xbae   :  { %v784_v29 = vmul.f32 %v2157_v39, %v782_v28  ;;  %v794_v51 = vrot.slane %v2157_v39, 2 }
 0xbaf   :  { %v2159_v32 = vpop.eup %2158 }
 0xbb0   :  { %v778_v23 = vmul.f32 %v2159_v32, %v703_v46  ;;  %v786_v48 = vrot.slane %v784_v29, 2  ;;  %v792_v50 = vmul.f32 %v2159_v32, %v790_v34 }
 0xbb2   :  { %v2530_v15 = vadd.f32 %v786_v48, %v778_v23  ;;  %v2532_v36 = vadd.f32 %v794_v51, %v792_v50 }
 0xbb4   :  { %v802_v52 = vrot.slane %v2530_v15, 6  ;;  %2160 = vrcp.f32 %v2532_v36 }
 0xbb5   :  { %2162 = vpow2.f32 %v1875_v57 }
 0xbb6   :  { %803 = vrot.lane.b32.xlu0 %v802_v52, %s2269_s28 }
 0xbbe   :  { %v2161_v45 = vpop.eup %2160 }
 0xbbf   :  { %v798_v53 = vmul.f32 %v2161_v45, %v2532_v36  ;;  %v2163_v58 = vpop.eup %2162 }
 0xbc0   :  { %v774_v59 = vadd.f32 1.0, %v2163_v58 }
 0xbc1   :  { %v799_v44 = vsub.f32 2.0, %v798_v53 }
 0xbc2   :  { %2164 = vrcp.f32 %v774_v59 }
 0xbc3   :  { %v800_v46 = vmul.f32 %v2161_v45, %v799_v44 }
 0xbc5   :  { %v808_v54 = vrot.slane %v800_v46, 6  ;;  %v889_v46 = vrot.slane %v2532_v36, 6 }
 0xbc7   :  { %809 = vrot.lane.b32.xlu1 %v808_v54, %s2269_s28 }
 0xbcc   :  { %v2165_v61 = vpop.eup %2164 }
 0xc28   :  { %v804_v60 = vpop.permute.xlu0 %803 }
 0xc29   :  { %v806_v47 = vmul.f32 %v2165_v61, %v804_v60 }
 0xc39   :  { %v810_v62 = vpop.permute.xlu1 %809 }
 0xc3a   :  { %v2541_v63 = vmul.f32 %v810_v62, %v806_v47 }
 0xc3c   :  { %821 = vperm.xlu1 %2063, %v2541_v63   ;;  %815 = vperm.xlu0 %2062, %v2541_v63  }
 0xc40   :  { %2064 = vset.pattern.permute.xlu1 %v2267_v16  ;;  %2065 = vset.pattern.permute.xlu0 %v2268_v17 }
 0xc41   :  { %827 = vperm.xlu1 %2064, %v2541_v63   ;;  %833 = vperm.xlu0 %2065, %v2541_v63  }
 0xc45   :  { %2067 = vset.pattern.permute.xlu1 %v2265_v0  ;;  %2066 = vset.pattern.permute.xlu0 %v2266_v1 }
 0xcbb   :  { %v822_v2 = vpop.permute.xlu1 %821  ;;  %v816_v3 = vpop.permute.xlu0 %815 }
 0xcbc   :  { %v818_v5 = vmul.f32 %v816_v3, %v2394_v19  ;;  %v824_v49 = vmul.f32 %v822_v2, %v2398_v21 }
 0xcbe   :  { %v819_v8 = vadd.f32 %v2359_v30, %v818_v5 }
 0xcc0   :  { %v828_v9 = vpop.permute.xlu1 %827  ;;  %v825_v13 = vadd.f32 %v824_v49, %v819_v8  ;;  %v834_v14 = vpop.permute.xlu0 %833 }
 0xcc1   :  { %v830_v18 = vmul.f32 %v828_v9, %v2403_v24  ;;  %v836_v33 = vmul.f32 %v834_v14, %v2409_v40 }
 0xcc3   :  { %v831_v20 = vadd.f32 %v830_v18, %v825_v13 }
 0xcc5   :  { %v837_v22 = vadd.f32 %v836_v33, %v831_v20 }
 0xcc7   :  { %v839_v55 = vrot.slane %v837_v22, 6 }
 0xcc9   :  { %v841_v25 = vadd.f32 %v2361_v31, %v839_v55 }
 0xccb   :  { %v843_v26 = vand.u32 2147483647, %v841_v25  ;;  %v842_v41 = vmin.f32 %v841_v25, 0.0  ;;  %v1876_v3 = vmul.f32 -1.442695, %v841_v25 }
 0xccd   :  { %v844_v27 = vsub.f32 0.0, %v843_v26 }
 0xccf   :  { %v845_v11 = vmul.f32 1.442695, %v844_v27 }
 0xcd1   :  { %2166 = vpow2.f32 %v845_v11 }
 0xcdb   :  { %v2167_v37 = vpop.eup %2166 }
 0xcdc   :  { %v847_v10 = vadd.f32 1.0, %v2167_v37 }
 0xcde   :  { %2168 = vlog2.f32 %v847_v10 }
 0xcdf   :  { %2170 = vtanh.f32 %v841_v25 }
 0xce8   :  { %v2169_v12 = vpop.eup %2168 }
 0xce9   :  { %v849_v4 = vmul.f32 0.6931472, %v2169_v12  ;;  %v2171_v43 = vpop.eup %2170 }
 0xceb   :  { %v850_v35 = vsub.f32 %v842_v41, %v849_v4 }
 0xced   :  { %v852_v42 = vrot.slane %v850_v35, 2 }
 0xcef   :  { %853 = vrot.lane.b32.xlu1 %v852_v42, %s2263_s1 }
 0xcf3   :  { %880 = vrot.lane.b32.xlu1 %v2171_v43, %s2264_s27 }
 0xd61   :  { %v854_v39 = vpop.permute.xlu1 %853 }
 0xd62   :  { %v856_v28 = vadd.f32 %v854_v39, %v2523_v38 }
 0xd64   :  { %v858_v29 = vrot.slane %v856_v28, 6 }
 0xd65   :  { %v881_v53 = vpop.permute.xlu1 %880 }
 0xd66   :  { %v2560_v34 = vmax.f32 %v841_v25, %v858_v29 }
 0xd68   :  { %v861_v32 = vsub.f32 %v841_v25, %v2560_v34  ;;  %v865_v23 = vrot.slane %v2560_v34, 2 }
 0xd6a   :  { %v862_v48 = vmul.f32 1.442695, %v861_v32  ;;  %v867_v50 = vsub.f32 %v856_v28, %v865_v23 }
 0xd6c   :  { %2172 = vpow2.f32 %v862_v48  ;;  %v868_v51 = vmul.f32 1.442695, %v867_v50 }
 0xd6e   :  { %2174 = vpow2.f32 %v868_v51 }
 0xd76   :  { %v2173_v45 = vpop.eup %2172 }
 0xd77   :  { %v883_v44 = vmul.f32 %v2173_v45, %v881_v53  ;;  %v893_v59 = vrot.slane %v2173_v45, 2 }
 0xd78   :  { %v2175_v54 = vpop.eup %2174 }
 0xd79   :  { %v877_v38 = vmul.f32 %v2175_v54, %v802_v52  ;;  %v885_v57 = vrot.slane %v883_v44, 2  ;;  %v891_v58 = vmul.f32 %v2175_v54, %v889_v46 }
 0xd7b   :  { %v2567_v60 = vadd.f32 %v885_v57, %v877_v38  ;;  %v2569_v61 = vadd.f32 %v893_v59, %v891_v58 }
 0xd7d   :  { %v901_v47 = vrot.slane %v2567_v60, 6  ;;  %2176 = vrcp.f32 %v2569_v61 }
 0xd7e   :  { %2178 = vpow2.f32 %v1876_v3 }
 0xd7f   :  { %902 = vrot.lane.b32.xlu0 %v901_v47, %s2269_s28 }
 0xd87   :  { %v2177_v36 = vpop.eup %2176 }
 0xd88   :  { %v897_v62 = vmul.f32 %v2177_v36, %v2569_v61  ;;  %v2179_v5 = vpop.eup %2178 }
 0xd89   :  { %v873_v49 = vadd.f32 1.0, %v2179_v5 }
 0xd8a   :  { %v898_v15 = vsub.f32 2.0, %v897_v62  ;;  %v988_v62 = vrot.slane %v2569_v61, 6 }
 0xd8b   :  { %2180 = vrcp.f32 %v873_v49 }
 0xd8c   :  { %v899_v52 = vmul.f32 %v2177_v36, %v898_v15 }
 0xd8e   :  { %v907_v2 = vrot.slane %v899_v52, 6 }
 0xd90   :  { %908 = vrot.lane.b32.xlu1 %v907_v2, %s2269_s28 }
 0xd95   :  { %v2181_v9 = vpop.eup %2180 }
 0xdf1   :  { %v903_v8 = vpop.permute.xlu0 %902 }
 0xdf2   :  { %v905_v13 = vmul.f32 %v2181_v9, %v903_v8 }
 0xe02   :  { %v909_v14 = vpop.permute.xlu1 %908 }
 0xe03   :  { %v2578_v18 = vmul.f32 %v909_v14, %v905_v13 }
 0xe05   :  { %920 = vperm.xlu1 %2067, %v2578_v18   ;;  %914 = vperm.xlu0 %2066, %v2578_v18  }
 0xe09   :  { %2068 = vset.pattern.permute.xlu1 %v2267_v16  ;;  %2069 = vset.pattern.permute.xlu0 %v2268_v17 }
 0xe0a   :  { %926 = vperm.xlu1 %2068, %v2578_v18   ;;  %932 = vperm.xlu0 %2069, %v2578_v18  }
 0xe0e   :  { %2071 = vset.pattern.permute.xlu1 %v2265_v0  ;;  %2070 = vset.pattern.permute.xlu0 %v2266_v1 }
 0xe84   :  { %v921_v20 = vpop.permute.xlu1 %920  ;;  %v915_v33 = vpop.permute.xlu0 %914 }
 0xe85   :  { %v917_v22 = vmul.f32 %v915_v33, %v2394_v19  ;;  %v923_v55 = vmul.f32 %v921_v20, %v2398_v21 }
 0xe87   :  { %v918_v25 = vadd.f32 %v2359_v30, %v917_v22 }
 0xe89   :  { %v927_v26 = vpop.permute.xlu1 %926  ;;  %v924_v27 = vadd.f32 %v923_v55, %v918_v25  ;;  %v933_v11 = vpop.permute.xlu0 %932 }
 0xe8a   :  { %v929_v37 = vmul.f32 %v927_v26, %v2403_v24  ;;  %v935_v12 = vmul.f32 %v933_v11, %v2409_v40  ;;  %v1115_v11 = vsel %vm1110_vm10, %v2541_v63, %v2578_v18 }
 0xe8c   :  { %v930_v10 = vadd.f32 %v929_v37, %v924_v27 }
 0xe8e   :  { %v936_v41 = vadd.f32 %v935_v12, %v930_v10 }
 0xe90   :  { %v938_v0 = vrot.slane %v936_v41, 6 }
 0xe92   :  { %v940_v1 = vadd.f32 %v2361_v31, %v938_v0 }
 0xe94   :  { %v942_v4 = vand.u32 2147483647, %v940_v1  ;;  %v941_v28 = vmin.f32 %v940_v1, 0.0  ;;  %v1877_v14 = vmul.f32 -1.442695, %v940_v1 }
 0xe96   :  { %v943_v35 = vsub.f32 0.0, %v942_v4 }
 0xe98   :  { %v944_v42 = vmul.f32 1.442695, %v943_v35 }
 0xe9a   :  { %2182 = vpow2.f32 %v944_v42 }
 0xea4   :  { %v2183_v43 = vpop.eup %2182 }
 0xea5   :  { %v946_v39 = vadd.f32 1.0, %v2183_v43 }
 0xea7   :  { %2184 = vlog2.f32 %v946_v39 }
 0xea8   :  { %2186 = vtanh.f32 %v940_v1 }
 0xeb1   :  { %v2185_v30 = vpop.eup %2184 }
 0xeb2   :  { %v948_v29 = vmul.f32 0.6931472, %v2185_v30  ;;  %v2187_v48 = vpop.eup %2186 }
 0xeb4   :  { %v949_v32 = vsub.f32 %v941_v28, %v948_v29 }
 0xeb6   :  { %v951_v23 = vrot.slane %v949_v32, 2 }
 0xeb8   :  { %952 = vrot.lane.b32.xlu1 %v951_v23, %s2263_s1 }
 0xebc   :  { %979 = vrot.lane.b32.xlu1 %v2187_v48, %s2264_s27 }
 0xf2a   :  { %v953_v50 = vpop.permute.xlu1 %952 }
 0xf2b   :  { %v955_v51 = vadd.f32 %v953_v50, %v2560_v34 }
 0xf2d   :  { %v957_v45 = vrot.slane %v955_v51, 6 }
 0xf2e   :  { %v980_v59 = vpop.permute.xlu1 %979 }
 0xf2f   :  { %v2597_v53 = vmax.f32 %v940_v1, %v957_v45 }
 0xf31   :  { %v960_v44 = vsub.f32 %v940_v1, %v2597_v53  ;;  %v964_v46 = vrot.slane %v2597_v53, 2  ;;  %v2234_v1 = vld [vmem:[#allocation2 + $0xc8] ss:$0 sm:$0xff] }
 0xf33   :  { %v961_v54 = vmul.f32 1.442695, %v960_v44  ;;  %v966_v38 = vsub.f32 %v955_v51, %v964_v46 }
 0xf35   :  { %2188 = vpow2.f32 %v961_v54  ;;  %v967_v57 = vmul.f32 1.442695, %v966_v38 }
 0xf37   :  { %2190 = vpow2.f32 %v967_v57 }
 0xf3f   :  { %v2189_v58 = vpop.eup %2188 }
 0xf40   :  { %v982_v36 = vmul.f32 %v2189_v58, %v980_v59  ;;  %v992_v3 = vrot.slane %v2189_v58, 2 }
 0xf41   :  { %v2191_v15 = vpop.eup %2190 }
 0xf42   :  { %v976_v34 = vmul.f32 %v2191_v15, %v901_v47  ;;  %v984_v52 = vrot.slane %v982_v36, 2  ;;  %v990_v2 = vmul.f32 %v2191_v15, %v988_v62 }
 0xf44   :  { %v2604_v5 = vadd.f32 %v984_v52, %v976_v34  ;;  %v2606_v49 = vadd.f32 %v992_v3, %v990_v2 }
 0xf46   :  { %v1000_v8 = vrot.slane %v2604_v5, 6  ;;  %2192 = vrcp.f32 %v2606_v49  ;;  %v1087_v34 = vrot.slane %v2606_v49, 6 }
 0xf47   :  { %2194 = vpow2.f32 %v1877_v14 }
 0xf48   :  { %1001 = vrot.lane.b32.xlu0 %v1000_v8, %s2269_s28 }
 0xf50   :  { %v2193_v61 = vpop.eup %2192 }
 0xf51   :  { %v996_v9 = vmul.f32 %v2193_v61, %v2606_v49  ;;  %v2195_v20 = vpop.eup %2194 }
 0xf52   :  { %v972_v33 = vadd.f32 1.0, %v2195_v20 }
 0xf53   :  { %v997_v60 = vsub.f32 2.0, %v996_v9 }
 0xf54   :  { %2196 = vrcp.f32 %v972_v33 }
 0xf55   :  { %v998_v47 = vmul.f32 %v2193_v61, %v997_v60 }
 0xf57   :  { %v1006_v13 = vrot.slane %v998_v47, 6 }
 0xf59   :  { %1007 = vrot.lane.b32.xlu1 %v1006_v13, %s2269_s28 }
 0xf5e   :  { %v2197_v55 = vpop.eup %2196 }
 0xfba   :  { %v1002_v22 = vpop.permute.xlu0 %1001 }
 0xfbb   :  { %v1004_v25 = vmul.f32 %v2197_v55, %v1002_v22 }
 0xfcb   :  { %v1008_v26 = vpop.permute.xlu1 %1007 }
 0xfcc   :  { %v1010_v27 = vmul.f32 %v1008_v26, %v1004_v25 }
 0xfce   :  { %1019 = vperm.xlu1 %2071, %v1010_v27   ;;  %1013 = vperm.xlu0 %2070, %v1010_v27   ;;  %v2619_v37 = vsel %vm1112_vm11, %v1115_v11, %v1010_v27 }
 0xfd2   :  { %2072 = vset.pattern.permute.xlu1 %v2267_v16  ;;  %2073 = vset.pattern.permute.xlu0 %v2268_v17 }
 0xfd3   :  { %1025 = vperm.xlu1 %2072, %v1010_v27   ;;  %1031 = vperm.xlu0 %2073, %v1010_v27  }
0x104d   :  { %v1020_v10 = vpop.permute.xlu1 %1019  ;;  %v1014_v12 = vpop.permute.xlu0 %1013 }
0x104e   :  { %v1016_v41 = vmul.f32 %v1014_v12, %v2394_v19  ;;  %v1022_v0 = vmul.f32 %v1020_v10, %v2398_v21 }
0x1050   :  { %v1017_v4 = vadd.f32 %v2234_v1, %v1016_v41 }
0x1052   :  { %v1026_v63 = vpop.permute.xlu1 %1025  ;;  %v1023_v18 = vadd.f32 %v1022_v0, %v1017_v4  ;;  %v1032_v35 = vpop.permute.xlu0 %1031 }
0x1053   :  { %v1028_v42 = vmul.f32 %v1026_v63, %v2403_v24  ;;  %v1034_v16 = vmul.f32 %v1032_v35, %v2409_v40 }
0x1055   :  { %v1029_v43 = vadd.f32 %v1028_v42, %v1023_v18 }
0x1057   :  { %v1035_v39 = vadd.f32 %v1034_v16, %v1029_v43 }
0x1059   :  { %v1037_v17 = vrot.slane %v1035_v39, 6 }
0x105b   :  { %v1039_v30 = vadd.f32 %v2361_v31, %v1037_v17 }
0x105d   :  { %v1041_v28 = vand.u32 2147483647, %v1039_v30  ;;  %v1040_v48 = vmin.f32 %v1039_v30, 0.0  ;;  %v1878_v5 = vmul.f32 -1.442695, %v1039_v30 }
0x105f   :  { %v1042_v29 = vsub.f32 0.0, %v1041_v28 }
0x1061   :  { %v1043_v32 = vmul.f32 1.442695, %v1042_v29 }
0x1063   :  { %2198 = vpow2.f32 %v1043_v32 }
0x106d   :  { %v2199_v19 = vpop.eup %2198 }
0x106e   :  { %v1045_v21 = vadd.f32 1.0, %v2199_v19 }
0x1070   :  { %2200 = vlog2.f32 %v1045_v21 }
0x1071   :  { %2202 = vtanh.f32 %v1039_v30 }
0x107a   :  { %v2201_v23 = vpop.eup %2200 }
0x107b   :  { %v1047_v50 = vmul.f32 0.6931472, %v2201_v23  ;;  %v2203_v40 = vpop.eup %2202 }
0x107d   :  { %v1048_v51 = vsub.f32 %v1040_v48, %v1047_v50 }
0x107f   :  { %v1050_v24 = vrot.slane %v1048_v51, 2 }
0x1081   :  { %1051 = vrot.lane.b32.xlu1 %v1050_v24, %s2263_s1 }
0x1085   :  { %1078 = vrot.lane.b32.xlu1 %v2203_v40, %s2264_s27 }
0x10f3   :  { %v1052_v45 = vpop.permute.xlu1 %1051 }
0x10f4   :  { %v1054_v31 = vadd.f32 %v1052_v45, %v2597_v53 }
0x10f6   :  { %v1056_v44 = vrot.slane %v1054_v31, 6 }
0x10f7   :  { %v1079_v62 = vpop.permute.xlu1 %1078 }
0x10f8   :  { %v1058_v46 = vmax.f32 %v1039_v30, %v1056_v44 }
0x10fa   :  { %v1059_v54 = vsub.f32 %v1039_v30, %v1058_v46  ;;  %v1063_v38 = vrot.slane %v1058_v46, 2 }
0x10fc   :  { %v1060_v57 = vmul.f32 1.442695, %v1059_v54  ;;  %v1065_v58 = vsub.f32 %v1054_v31, %v1063_v38 }
0x10fe   :  { %2204 = vpow2.f32 %v1060_v57  ;;  %v1066_v59 = vmul.f32 1.442695, %v1065_v58 }
0x1100   :  { %2206 = vpow2.f32 %v1066_v59 }
0x1108   :  { %v2205_v36 = vpop.eup %2204 }
0x1109   :  { %v1081_v15 = vmul.f32 %v2205_v36, %v1079_v62  ;;  %v1091_v61 = vrot.slane %v2205_v36, 2 }
0x110a   :  { %v2207_v52 = vpop.eup %2206 }
0x110b   :  { %v1075_v2 = vmul.f32 %v2207_v52, %v1000_v8  ;;  %v1083_v3 = vrot.slane %v1081_v15, 2  ;;  %v1089_v53 = vmul.f32 %v2207_v52, %v1087_v34 }
0x110d   :  { %v1085_v9 = vadd.f32 %v1083_v3, %v1075_v2  ;;  %v1093_v60 = vadd.f32 %v1091_v61, %v1089_v53 }
0x110f   :  { %v1099_v47 = vrot.slane %v1085_v9, 6  ;;  %2208 = vrcp.f32 %v1093_v60 }
0x1110   :  { %2210 = vpow2.f32 %v1878_v5 }
0x1111   :  { %1100 = vrot.lane.b32.xlu0 %v1099_v47, %s2269_s28 }
0x1115   :  { %1120 = vrot.lane.b32.xlu0 %v2508_v56, %s2270_s29 }
0x1119   :  { %v2209_v13 = vpop.eup %2208 }
0x111a   :  { %v1095_v14 = vmul.f32 %v2209_v13, %v1093_v60  ;;  %v2211_v8 = vpop.eup %2210 }
0x111b   :  { %v1071_v22 = vadd.f32 1.0, %v2211_v8 }
0x111c   :  { %v1096_v49 = vsub.f32 2.0, %v1095_v14 }
0x111d   :  { %2212 = vrcp.f32 %v1071_v22 }
0x111e   :  { %v1097_v20 = vmul.f32 %v2209_v13, %v1096_v49 }
0x1120   :  { %v1105_v33 = vrot.slane %v1097_v20, 6 }
0x1122   :  { %1106 = vrot.lane.b32.xlu1 %v1105_v33, %s2269_s28  ;;  %v1879_v33 = vld [vmem:[#allocation2 + $0xd0] ss:$0 sm:$0xff] }
0x1126   :  { %1162 = vrot.lane.b32.xlu1 %v2508_v56, %s2271_s30 }
0x1127   :  { %v2213_v25 = vpop.eup %2212 }
0x1183   :  { %v1101_v55 = vpop.permute.xlu0 %1100 }
0x1184   :  { %v1103_v26 = vmul.f32 %v2213_v25, %v1101_v55 }
0x1187   :  { %v1121_v12 = vpop.permute.xlu0 %1120 }
0x1188   :  { %v1127_v41 = vsel %vm1126_vm12, %v1121_v12, 0.0 }
0x1194   :  { %v1107_v27 = vpop.permute.xlu1 %1106 }
0x1195   :  { %v1109_v11 = vmul.f32 %v1107_v27, %v1103_v26 }
0x1197   :  { %v1117_v10 = vsel %vm40_vm0, %v2619_v37, %v1109_v11  ;;  %vm1767_vm0 = vcmask 162816  }
0x1198   :  { %1164 = vrot.lane.b32.xlu1 %v1117_v10, %s2271_s30  ;;  %1122 = vrot.lane.b32.xlu0 %v1117_v10, %s2270_s29  ;;  %v1163_v0 = vpop.permute.xlu1 %1162 }
0x1199   :  { %v1168_v1 = vsel %vm1126_vm12, %v1163_v0, 0.0 }
0x11b7   :  { %1128 = vadd.xlane.f32.xlu0 %v1127_v41 }
0x11bc   :  { %1169 = vadd.xlane.f32.xlu1 %v1168_v1 }
0x120a   :  { %v1123_v4 = vpop.permute.xlu0 %1122  ;;  %v1165_v18 = vpop.permute.xlu1 %1164 }
0x120b   :  { %v1130_v63 = vsel %vm1126_vm12, %v1123_v4, 0.0  ;;  %v1171_v37 = vsel %vm1126_vm12, %v1165_v18, 0.0 }
0x120c   :  { %1131 = vadd.xlane.f32.xlu0 %v1130_v63 }
0x1210   :  { %1172 = vadd.xlane.f32.xlu0 %v1171_v37 }
0x1244   :  { %v1129_v35 = vpop.xlane.xlu0 %1128 }
0x1245   :  { %v1134_v42 = vmul.f32 0.5, %v1129_v35 }
0x1247   :  { %v1136_v43 = vsub.f32 %v2508_v56, %v1134_v42 }
0x1249   :  { %v1170_v16 = vpop.xlane.xlu1 %1169  ;;  %v1138_v39 = vmul.f32 %v1136_v43, %v1136_v43 }
0x124a   :  { %v1174_v17 = vmul.f32 0.5, %v1170_v16  ;;  %v1262_v16 = vld [vmem:[#allocation2 + $0x20] sm:$0xf] }
0x124b   :  { %1142 = vrot.lane.b32.xlu0 %v1138_v39, %s2270_s29  ;;  %v1347_v39 = vld [vmem:[#allocation2 + $0x28] sm:$0xf]  ;;  %1948 = vmatprep.subr.msk.mxu0 %vm1112_vm11, %v1262_v16 }
0x124c   :  { %v1176_v30 = vsub.f32 %v2508_v56, %v1174_v17  ;;  %1953 = vmatprep.subr.msk.mxu1 %vm1112_vm11, %v1347_v39  ;;  %1949 = vmatpush3.msk.msra.mxu0 %vm1112_vm11, %v1262_v16 }
0x124d   :  { %1954 = vmatpush3.msk.msra.mxu1 %vm1112_vm11, %v1347_v39 }
0x124e   :  { %v1178_v28 = vmul.f32 %v1176_v30, %v1176_v30 }
0x1250   :  { %1182 = vrot.lane.b32.xlu1 %v1178_v28, %s2271_s30 }
0x1299   :  { %v1132_v29 = vpop.xlane.xlu0 %1131 }
0x129a   :  { %v1135_v32 = vmul.f32 0.5, %v1132_v29 }
0x129c   :  { %v1137_v19 = vsub.f32 %v1117_v10, %v1135_v32  ;;  %v1880_v32 = vld [vmem:[#allocation2 + $0xd8] ss:$0 sm:$0xff] }
0x129d   :  { %v1173_v21 = vpop.xlane.xlu0 %1172 }
0x129e   :  { %v1175_v23 = vmul.f32 0.5, %v1173_v21  ;;  %v1139_v48 = vmul.f32 %v1137_v19, %v1137_v19 }
0x12a0   :  { %v1177_v50 = vsub.f32 %v1117_v10, %v1175_v23  ;;  %1144 = vrot.lane.b32.xlu1 %v1139_v48, %s2270_s29 }
0x12a2   :  { %v1179_v51 = vmul.f32 %v1177_v50, %v1177_v50 }
0x12a4   :  { %1184 = vrot.lane.b32.xlu1 %v1179_v51, %s2271_s30 }
0x12bd   :  { %v1143_v24 = vpop.permute.xlu0 %1142 }
0x12be   :  { %v1148_v40 = vsel %vm1126_vm12, %v1143_v24, 0.0 }
0x12bf   :  { %1149 = vadd.xlane.f32.xlu0 %v1148_v40 }
0x12c2   :  { %v1183_v56 = vpop.permute.xlu1 %1182 }
0x12c3   :  { %v1188_v45 = vsel %vm1126_vm12, %v1183_v56, 0.0  ;;  %v1446_v56 = vld [vmem:[#allocation2 + $0x30] sm:$0xff] }
0x12c8   :  { %1189 = vadd.xlane.f32.xlu1 %v1188_v45  ;;  %v1447_v45 = vld [vmem:[#allocation2 + $0x38] sm:$0xff] }
0x1312   :  { %v1145_v31 = vpop.permute.xlu1 %1144 }
0x1313   :  { %v1151_v44 = vsel %vm1126_vm12, %v1145_v31, 0.0  ;;  %v2002_v31 = vpack.c.bf16 %v1447_v45, %v1446_v56  ;;  %v1889_v56 = vld [vmem:[#allocation2 + $0xe0] ss:$0 sm:$0xff] }
0x1314   :  { %1152 = vadd.xlane.f32.xlu0 %v1151_v44  ;;  %v1448_v44 = vld [vmem:[#allocation2 + $0x40] sm:$0xff] }
0x1315   :  { %2003 = vmatprep.subr.bf16.mxu0 %v2002_v31 }
0x1316   :  { %v1185_v46 = vpop.permute.xlu1 %1184 }
0x1317   :  { %v1191_v54 = vsel %vm1126_vm12, %v1185_v46, 0.0  ;;  %v1449_v46 = vld [vmem:[#allocation2 + $0x48] sm:$0xff] }
0x1318   :  { %1192 = vadd.xlane.f32.xlu0 %v1191_v54  ;;  %v2006_v54 = vpack.c.bf16 %v1449_v46, %v1448_v44 }
0x134c   :  { %v1150_v38 = vpop.xlane.xlu0 %1149 }
0x134d   :  { %v1154_v57 = vmul.f32 0.5, %v1150_v38  ;;  %v1450_v38 = vld [vmem:[#allocation2 + $0x50] sm:$0xff] }
0x134f   :  { %v1156_v58 = vadd.f32 1e-05, %v1154_v57  ;;  %v1451_v57 = vld [vmem:[#allocation2 + $0x58] sm:$0xff] }
0x1351   :  { %2214 = vrsqrt.f32 %v1156_v58  ;;  %v2010_v58 = vpack.c.bf16 %v1451_v57, %v1450_v38  ;;  %v1666_v38 = vld [vmem:[#allocation2 + $0x90] sm:$0x3f] }
0x1355   :  { %v1190_v59 = vpop.xlane.xlu1 %1189 }
0x1356   :  { %v1194_v36 = vmul.f32 0.5, %v1190_v59  ;;  %v1452_v59 = vld [vmem:[#allocation2 + $0x60] sm:$0xff] }
0x1358   :  { %v1196_v62 = vadd.f32 1e-05, %v1194_v36  ;;  %v1453_v36 = vld [vmem:[#allocation2 + $0x68] sm:$0xff] }
0x135a   :  { %2216 = vrsqrt.f32 %v1196_v62  ;;  %v2014_v62 = vpack.c.bf16 %v1453_v36, %v1452_v59 }
0x135b   :  { %v2215_v15 = vpop.eup %2214 }
0x135c   :  { %v1160_v34 = vmul.f32 %v2215_v15, %v1136_v43 }
0x135e   :  { %1204 = vrot.lane.b32.xlu0 %v1160_v34, %s2270_s29 }
0x1364   :  { %v2217_v52 = vpop.eup %2216 }
0x1365   :  { %v1200_v2 = vmul.f32 %v2217_v52, %v1176_v30 }
0x1367   :  { %1212 = vrot.lane.b32.xlu1 %v1200_v2, %s2270_s29 }
0x13a1   :  { %v1153_v3 = vpop.xlane.xlu0 %1152 }
0x13a2   :  { %v1155_v53 = vmul.f32 0.5, %v1153_v3 }
0x13a4   :  { %v1157_v61 = vadd.f32 1e-05, %v1155_v53 }
0x13a5   :  { %v1193_v9 = vpop.xlane.xlu0 %1192 }
0x13a6   :  { %2218 = vrsqrt.f32 %v1157_v61  ;;  %v1195_v60 = vmul.f32 0.5, %v1193_v9 }
0x13a8   :  { %v1197_v47 = vadd.f32 1e-05, %v1195_v60 }
0x13aa   :  { %2220 = vrsqrt.f32 %v1197_v47 }
0x13b0   :  { %v2219_v13 = vpop.eup %2218 }
0x13b1   :  { %v1161_v14 = vmul.f32 %v2219_v13, %v1137_v19 }
0x13b3   :  { %1206 = vrot.lane.b32.xlu1 %v1161_v14, %s2270_s29 }
0x13b4   :  { %v2221_v49 = vpop.eup %2220 }
0x13b5   :  { %v1201_v20 = vmul.f32 %v2221_v49, %v1177_v50 }
0x13b7   :  { %1214 = vrot.lane.b32.xlu1 %v1201_v20, %s2270_s29 }
0x13d0   :  { %v1205_v5 = vpop.permute.xlu0 %1204 }
0x13d9   :  { %v1213_v8 = vpop.permute.xlu1 %1212 }
0x13da   :  { %v1218_v22 = vsel %vm1126_vm12, %v1205_v5, %v1213_v8 }
0x13db   :  { %v1225_v55 = vmul.f32 %v1879_v33, %v1218_v22 }
0x13dd   :  { %v2664_v25 = vadd.f32 %v1225_v55, %v2309_v6 }
0x13df   :  { %v1230_v26 = vsel %vm120_vm2, %v2664_v25, 0.0 }
0x13e0   :  { %1231 = vadd.xlane.f32.xlu0 %v1230_v26 }
0x1425   :  { %v1207_v27 = vpop.permute.xlu1 %1206 }
0x1429   :  { %v1215_v11 = vpop.permute.xlu1 %1214 }
0x142a   :  { %v1219_v10 = vsel %vm1126_vm12, %v1207_v27, %v1215_v11 }
0x142b   :  { %v1226_v12 = vmul.f32 %v1879_v33, %v1219_v10 }
0x142d   :  { %v2670_v41 = vadd.f32 %v1226_v12, %v2311_v7 }
0x142f   :  { %v1233_v0 = vsel %vm120_vm2, %v2670_v41, 0.0 }
0x1430   :  { %1234 = vadd.xlane.f32.xlu1 %v1233_v0 }
0x146d   :  { %v1232_v1 = vpop.xlane.xlu0 %1231 }
0x146e   :  { %v1236_v4 = vmul.f32 0.25, %v1232_v1 }
0x1470   :  { %v1238_v6 = vsub.f32 %v2664_v25, %v1236_v4 }
0x1472   :  { %v1240_v63 = vmul.f32 %v1238_v6, %v1238_v6 }
0x1474   :  { %v1242_v18 = vsel %vm120_vm2, %v1240_v63, 0.0 }
0x1475   :  { %1243 = vadd.xlane.f32.xlu0 %v1242_v18 }
0x14bd   :  { %v1235_v37 = vpop.xlane.xlu1 %1234 }
0x14be   :  { %v1237_v35 = vmul.f32 0.25, %v1235_v37 }
0x14c0   :  { %v1239_v42 = vsub.f32 %v2670_v41, %v1237_v35 }
0x14c2   :  { %v1241_v43 = vmul.f32 %v1239_v42, %v1239_v42 }
0x14c4   :  { %v1245_v7 = vsel %vm120_vm2, %v1241_v43, 0.0 }
0x14c5   :  { %1246 = vadd.xlane.f32.xlu0 %v1245_v7 }
0x1502   :  { %v1244_v17 = vpop.xlane.xlu0 %1243 }
0x1503   :  { %v1248_v30 = vmul.f32 0.25, %v1244_v17 }
0x1505   :  { %v1250_v28 = vadd.f32 1e-05, %v1248_v30 }
0x1507   :  { %2222 = vrsqrt.f32 %v1250_v28  ;;  %v1663_v28 = vld [vmem:[#allocation2 + $0x78] sm:$0xff] }
0x1511   :  { %v2223_v29 = vpop.eup %2222 }
0x1512   :  { %v1254_v19 = vmul.f32 %v2223_v29, %v1238_v6  ;;  %v1664_v29 = vld [vmem:[#allocation2 + $0x80] sm:$0xff] }
0x1514   :  { %v1260_v21 = vmul.f32 %v1880_v32, %v1254_v19 }
0x1516   :  { %1950 = vmatprep.mubr.msk.f32.mxu0 %vm120_vm2, %v1260_v21  ;;  %1955 = vmatprep.mubr.msk.f32.mxu1 %vm120_vm2, %v1260_v21 }
0x1552   :  { %v1247_v23 = vpop.xlane.xlu0 %1246 }
0x1553   :  { %v1249_v48 = vmul.f32 0.25, %v1247_v23 }
0x1555   :  { %v1251_v50 = vadd.f32 1e-05, %v1249_v48 }
0x1557   :  { %2224 = vrsqrt.f32 %v1251_v50 }
0x1561   :  { %v2225_v51 = vpop.eup %2224 }
0x1562   :  { %v1255_v24 = vmul.f32 %v2225_v51, %v1239_v42 }
0x1564   :  { %v1261_v40 = vmul.f32 %v1880_v32, %v1255_v24  ;;  %v2018_v32 = vpack.c.bf16 %v1664_v29, %v1663_v28 }
0x1566   :  { %1951 = vmatmul.mubr.msk.f32.vlgmr.msra.gmra.mrb[2].mxu0 %vm120_vm2, %v1261_v40  ;;  %1956 = vmatmul.mubr.msk.f32.vlgmr.msra.gmra.mrb[2].mxu1 %vm120_vm2, %v1261_v40 }
0x1567   :  { %2005 = vmatpush3.bf16.msra.mxu0 %v2002_v31 }
0x1568   :  { %2007 = vmatprep.subr.bf16.mxu0 %v2006_v54 }
0x156b   :  { %2009 = vmatpush3.bf16.msra.mxu0 %v2006_v54  ;;  %v1665_v54 = vld [vmem:[#allocation2 + $0x88] sm:$0xff] }
0x156c   :  { %2011 = vmatprep.subr.bf16.mxu0 %v2010_v58  ;;  %v2022_v57 = vpack.c.bf16 %v1666_v38, %v1665_v54 }
0x156f   :  { %2013 = vmatpush3.bf16.msra.mxu0 %v2010_v58  ;;  %v1890_v58 = vld [vmem:[#allocation2 + $0xe8] ss:$0 sm:$0xff] }
0x1570   :  { %2015 = vmatprep.subr.bf16.mxu0 %v2014_v62 }
0x1573   :  { %2017 = vmatpush3.bf16.msra.mxu0 %v2014_v62 }
0x1639   :  { %v1952_v15 = vpop.f32.mrb[2].mxu0  ;;  %v1957_v34 = vpop.f32.mrb[2].mxu1 }
0x163a   :  { %v1427_v52 = vmul.f32 %v1952_v15, %v1952_v15  ;;  %v1338_v2 = vpop.f32.mrb[3].mxu0  ;;  %v1417_v3 = vpop.f32.mrb[3].mxu1 }
0x163b   :  { %v1426_v53 = vmul.f32 %v1338_v2, %v1338_v2 }
0x163c   :  { %v1429_v61 = vmul.f32 %v1952_v15, %v1427_v52 }
0x163d   :  { %v1428_v9 = vmul.f32 %v1426_v53, %v1338_v2 }
0x163e   :  { %v1431_v60 = vmul.f32 0.044715, %v1429_v61  ;;  %v1761_v61 = vld [vmem:[#allocation2 + $0xa8] sm:$0xf] }
0x163f   :  { %v1430_v47 = vmul.f32 0.044715, %v1428_v9  ;;  %v1894_v9 = vld [vmem:[#allocation2 + $0xf0] ss:$0 sm:$0xff] }
0x1640   :  { %v1433_v13 = vadd.f32 %v1952_v15, %v1431_v60 }
0x1641   :  { %v1432_v14 = vadd.f32 %v1430_v47, %v1338_v2 }
0x1642   :  { %v1435_v49 = vmul.f32 0.7978846, %v1433_v13 }
0x1643   :  { %v1434_v20 = vmul.f32 0.7978846, %v1432_v14 }
0x1644   :  { %2226 = vtanh.f32 %v1435_v49 }
0x1645   :  { %2228 = vtanh.f32 %v1434_v20 }
0x164e   :  { %v2227_v33 = vpop.eup %2226 }
0x164f   :  { %v2229_v5 = vpop.eup %2228  ;;  %v1439_v8 = vadd.f32 1.0, %v2227_v33  ;;  %v1898_v33 = vld [vmem:[#allocation2 + $0xf8] ss:$0 sm:$0xff] }
0x1650   :  { %v1438_v22 = vadd.f32 1.0, %v2229_v5 }
0x1651   :  { %v1441_v55 = vmul.f32 0.5, %v1439_v8 }
0x1652   :  { %v1440_v26 = vmul.f32 0.5, %v1438_v22 }
0x1653   :  { %v1443_v27 = vmul.f32 %v1952_v15, %v1441_v55 }
0x1654   :  { %v1442_v11 = vmul.f32 %v1440_v26, %v1338_v2  ;;  %v1759_v2 = vld [vmem:[#allocation2 + $0x98] sm:$0xff] }
0x1655   :  { %v1445_v10 = vmul.f32 %v1957_v34, %v1443_v27 }
0x1656   :  { %v1444_v12 = vmul.f32 %v1442_v11, %v1417_v3  ;;  %v1760_v3 = vld [vmem:[#allocation2 + $0xa0] sm:$0xff] }
0x1657   :  { %v2028_v53 = vpack.c.bf16 %v1760_v3, %v1759_v2 }
0x1658   :  { %1974 = vmatprep.mubr.msk.f32.mxu0 %vm1454_vm13, %v1444_v12 }
0x1659   :  { %1975 = vmatmul.mubr.msk.f32.vlgmr.msra.gmra.mrb[4].mxu0 %vm1454_vm13, %v1445_v10 }
0x172c   :  { %v1976_v0 = vpop.f32.mrb[4].mxu0 }
0x172d   :  { %v1537_v1 = vadd.f32 %v1976_v0, %v2670_v41  ;;  %v1527_v4 = vpop.f32.mrb[5].mxu0 }
0x172e   :  { %v1536_v6 = vadd.f32 %v1527_v4, %v2664_v25  ;;  %v1571_v25 = vld [vmem:[#allocation2 + $0x70] sm:$0xf] }
0x172f   :  { %v1542_v63 = vsel %vm120_vm2, %v1537_v1, 0.0  ;;  %1977 = vmatprep.subr.msk.mxu1 %vm1112_vm11, %v1571_v25 }
0x1730   :  { %1543 = vadd.xlane.f32.xlu1 %v1542_v63  ;;  %v1539_v18 = vsel %vm120_vm2, %v1536_v6, 0.0  ;;  %1978 = vmatpush3.msk.msra.mxu1 %vm1112_vm11, %v1571_v25 }
0x1731   :  { %1540 = vadd.xlane.f32.xlu0 %v1539_v18  ;;  %2019 = vmatprep.subr.bf16.mxu1 %v2018_v32 }
0x17bd   :  { %v1544_v37 = vpop.xlane.xlu1 %1543 }
0x17be   :  { %v1546_v35 = vmul.f32 0.25, %v1544_v37  ;;  %v1541_v42 = vpop.xlane.xlu0 %1540 }
0x17bf   :  { %v1545_v43 = vmul.f32 0.25, %v1541_v42 }
0x17c0   :  { %v1548_v7 = vsub.f32 %v1537_v1, %v1546_v35 }
0x17c1   :  { %v1547_v16 = vsub.f32 %v1536_v6, %v1545_v43 }
0x17c2   :  { %v1550_v39 = vmul.f32 %v1548_v7, %v1548_v7 }
0x17c3   :  { %v1549_v17 = vmul.f32 %v1547_v16, %v1547_v16 }
0x17c4   :  { %v1554_v30 = vsel %vm120_vm2, %v1550_v39, 0.0 }
0x17c5   :  { %1555 = vadd.xlane.f32.xlu1 %v1554_v30  ;;  %v1551_v41 = vsel %vm120_vm2, %v1549_v17, 0.0 }
0x17c6   :  { %1552 = vadd.xlane.f32.xlu0 %v1551_v41 }
0x1852   :  { %v1556_v19 = vpop.xlane.xlu1 %1555 }
0x1853   :  { %v1558_v21 = vmul.f32 0.25, %v1556_v19  ;;  %v1553_v23 = vpop.xlane.xlu0 %1552 }
0x1854   :  { %v1557_v48 = vmul.f32 0.25, %v1553_v23 }
0x1855   :  { %v1560_v50 = vadd.f32 1e-05, %v1558_v21 }
0x1856   :  { %v1559_v51 = vadd.f32 1e-05, %v1557_v48 }
0x1857   :  { %2230 = vrsqrt.f32 %v1560_v50 }
0x1858   :  { %2232 = vrsqrt.f32 %v1559_v51 }
0x1861   :  { %v2231_v24 = vpop.eup %2230 }
0x1862   :  { %v2233_v40 = vpop.eup %2232  ;;  %v1564_v45 = vmul.f32 %v2231_v24, %v1548_v7 }
0x1863   :  { %v1563_v31 = vmul.f32 %v2233_v40, %v1547_v16 }
0x1864   :  { %v1570_v46 = vmul.f32 %v1889_v56, %v1564_v45 }
0x1865   :  { %v1569_v44 = vmul.f32 %v1889_v56, %v1563_v31 }
0x1867   :  { %1979 = vmatprep.mubr.msk.f32.mxu1 %vm120_vm2, %v1569_v44 }
0x1868   :  { %1980 = vmatmul.mubr.msk.f32.vlgmr.msra.gmra.mrb[4].mxu1 %vm120_vm2, %v1570_v46  ;;  %vm1852_vm2 = vcmask 7168  }
0x1869   :  { %2021 = vmatpush3.bf16.msra.mxu1 %v2018_v32 }
0x186a   :  { %2024 = vmatprep.subr.msk.bf16.mxu1 %vm2023_vm15, %v2022_v57 }
0x186d   :  { %2027 = vmatpush3.bf16.msk.msra.mxu1 %vm2023_vm15, %v2022_v57 }
0x186e   :  { %2029 = vmatprep.subr.bf16.mxu1 %v2028_v53 }
0x193b   :  { %v1981_v59 = vpop.f32.mrb[4].mxu1 }
0x193c   :  { %v1658_v36 = vadd.f32 %v1981_v59, %v1890_v58  ;;  %v1652_v62 = vpop.f32.mrb[5].mxu1 }
0x193d   :  { %v1653_v15 = vadd.f32 %v1890_v58, %v1652_v62 }
0x193e   :  { %v1662_v52 = vmax.f32 %v1658_v36, 0.0 }
0x193f   :  { %v1661_v34 = vmax.f32 %v1653_v15, 0.0 }
0x1941   :  { %1990 = vmatprep.mubr.msk.f32.mxu1 %vm1672_vm1, %v1661_v34 }
0x1942   :  { %1991 = vmatmul.mubr.msk.f32.vlgmr.msra.gmra.mrb[6].mxu1 %vm1672_vm1, %v1662_v52 }
0x1943   :  { %2031 = vmatpush3.bf16.msra.mxu1 %v2028_v53 }
0x1944   :  { %1997 = vmatprep.subr.msk.mxu1 %vm1112_vm11, %v1761_v61 }
0x1947   :  { %1998 = vmatpush3.msk.msra.mxu1 %vm1112_vm11, %v1761_v61 }
0x1a15   :  { %v1992_v60 = vpop.f32.mrb[6].mxu1 }
0x1a16   :  { %v1754_v47 = vadd.f32 %v1992_v60, %v1894_v9  ;;  %v1748_v13 = vpop.f32.mrb[7].mxu1 }
0x1a17   :  { %v1749_v14 = vadd.f32 %v1894_v9, %v1748_v13 }
0x1a18   :  { %v1758_v20 = vmax.f32 %v1754_v47, 0.0 }
0x1a19   :  { %v1757_v49 = vmax.f32 %v1749_v14, 0.0 }
0x1a1b   :  { %1999 = vmatprep.mubr.msk.f32.mxu1 %vm1767_vm0, %v1757_v49 }
0x1a1c   :  { %2000 = vmatmul.mubr.msk.f32.vlgmr.msra.gmra.mrb[8].mxu1 %vm1767_vm0, %v1758_v20 }
0x1aef   :  { %v2001_v5 = vpop.f32.mrb[8].mxu1 }
0x1af0   :  { %v1849_v8 = vadd.f32 %v2001_v5, %v1898_v33  ;;  %v1843_v22 = vpop.f32.mrb[9].mxu1 }
0x1af1   :  { %v1844_v55 = vadd.f32 %v1898_v33, %v1843_v22 }
0x1af2   :  { %1854 = vst.msk [vmem:[%s2707_s2 + $0x8] sm:$0xff] %vm1852_vm2, %v1849_v8 }
0x1af3   :  { %1853 = vst.msk [vmem:[%s2707_s2] sm:$0xff] %vm1852_vm2, %v1844_v55 }
0x1af4   :  { %1859 = vsyncpa [#allocation3], 1 }

</bundles_post_ra>
